<compile_context>
chip_gen: v7x
topology: tpu7x:2x2x1
jax: 0.10.0
libtpu: 0.0.40
codegen_flags: <defaults>
</compile_context>

<pallas_src>
import functools

import jax
import jax.numpy as jnp
from jax import lax
from jax.experimental import pallas as pl
from jax.experimental.pallas import tpu as pltpu


def _strip_att_kernel(x_ref, f_ref, p_ref, a_ref, o_ref, *, W):
    # x_ref block: (1, C, T) with T = tH * W flattened rows (lane-dense).
    # f_ref block: (1, C, 3)  per-channel tap coefficients [w-1, w, w+1].
    # p_ref block: (C, 3)     fused params [inside_all, lamb_l, lamb_h].
    # a_ref block: (T, T)     block-diagonal row-averaging matrix (1/W entries).
    x = x_ref[0].astype(jnp.float32)                     # (C, T)
    C, T = x.shape

    f = f_ref[0]                                         # (C, 3)
    p = p_ref[...]                                       # (C, 3)
    f_m1, f_0, f_p1 = f[:, 0:1], f[:, 1:2], f[:, 2:3]    # (C, 1) each
    inside, ll, lh = p[:, 0:1], p[:, 1:2], p[:, 2:3]     # (C, 1) each

    # Neighbour taps along the flattened spatial axis (XLU rolls), with
    # reflection fix-up at each row boundary (col % W == 0 / W-1).
    left = pltpu.roll(x, shift=1, axis=1)                # x[..., i-1] (wrapped)
    right = pltpu.roll(x, shift=T - 1, axis=1)           # x[..., i+1] (wrapped)
    colw = lax.broadcasted_iota(jnp.int32, (C, T), 1) % W
    x_m1 = jnp.where(colw == 0, right, left)             # reflect at row start
    x_p1 = jnp.where(colw == W - 1, left, right)         # reflect at row end

    out = f_m1 * x_m1 + f_0 * x + f_p1 * x_p1            # strip attention

    # Per-row mean over W, broadcast back to every position in the row, via a
    # single tiny MXU matmul against the resident averaging matrix.
    gap = jnp.dot(x, a_ref[...],
                  precision=lax.Precision.HIGHEST,
                  preferred_element_type=jnp.float32)    # (C, T)

    out_low = (out * (inside + 1.0) - inside * gap) * ll
    out_high = x * (lh + 1.0)
    o_ref[0] = (out_low + out_high).astype(o_ref.dtype)


def _choose_hw_tile(H, W, cap_lanes=512):
    """Pick T = tH*W (tH | H) that is a multiple of 128 and <= cap, else H*W."""
    HW = H * W
    cap = max(cap_lanes, W)
    best = None
    for tH in range(1, H + 1):
        if H % tH != 0:
            continue
        T = tH * W
        if T > cap:
            break
        if T % 128 == 0:
            best = T
    if best is None:
        # No lane-aligned row-multiple tile exists; fall back to the whole image
        # (block dim == full array dim is always legal).
        best = HW
    return best


def spatial_strip_att_pallas(x_nchw, conv_w, inside_all, lamb_l, lamb_h,
                             *, kernel=3, group=2):
    assert kernel == 3, "only kernel=3 (module default) implemented"
    N, C, H, W = x_nchw.shape
    assert W >= 2
    cpg = C // group
    HW = H * W

    # ---- hoisted: global avg pool -> 1x1 conv -> tanh (tiny, plain JAX) ----
    ap = jnp.mean(x_nchw.astype(jnp.float32), axis=(2, 3))            # (N, C)
    filt = jnp.tanh(jnp.matmul(ap, conv_w.astype(jnp.float32).T,
                               precision=lax.Precision.HIGHEST))      # (N, g*k)
    filt = filt.reshape(N, group, kernel)
    filt_nck = jnp.repeat(filt, cpg, axis=1)                          # (N, C, k)

    # ---- fuse the per-channel parameters into one resident (C, 3) block ----
    params = jnp.stack([inside_all.reshape(C).astype(jnp.float32),
                        lamb_l.reshape(C).astype(jnp.float32),
                        lamb_h.reshape(C).astype(jnp.float32)], axis=1)

    # ---- lane-dense spatial tiling ----
    T = _choose_hw_tile(H, W)
    num_t = HW // T

    # Block-diagonal averaging matrix: A[i, j] = 1/W if same row else 0.
    ridx = jnp.arange(T, dtype=jnp.int32) // W
    A = (ridx[:, None] == ridx[None, :]).astype(jnp.float32) * (1.0 / W)

    x_flat = x_nchw.reshape(N, C, HW)

    # VMEM budget estimate (bytes): in/out blocks double-buffered + resident A
    # + temporaries; generous headroom, clamped well under v7x's 64 MiB.
    tile_bytes = C * T * 4
    vmem_need = 12 * tile_bytes + 2 * T * T * 4 + 4 * 8 * 128 * 4
    vmem_limit = int(min(48 * 2**20, max(4 * vmem_need, 16 * 2**20)))

    out = pl.pallas_call(
        functools.partial(_strip_att_kernel, W=W),
        out_shape=jax.ShapeDtypeStruct((N, C, HW), x_nchw.dtype),
        grid_spec=pltpu.PrefetchScalarGridSpec(
            num_scalar_prefetch=0,
            grid=(N, num_t),
            in_specs=[
                pl.BlockSpec((1, C, T), lambda n, t: (n, 0, t)),     # x tile
                pl.BlockSpec((1, C, 3), lambda n, t: (n, 0, 0)),     # filt (per n)
                pl.BlockSpec((C, 3), lambda n, t: (0, 0)),           # fused params
                pl.BlockSpec((T, T), lambda n, t: (0, 0)),           # avg matrix
            ],
            out_specs=pl.BlockSpec((1, C, T), lambda n, t: (n, 0, t)),
        ),
        compiler_params=pltpu.CompilerParams(
            dimension_semantics=("parallel", "parallel"),
            vmem_limit_bytes=vmem_limit,
        ),
    )(x_flat, filt_nck, params, A)
    return out.reshape(N, C, H, W)


def spatial_strip_att_reference(x, conv_w, inside_all, lamb_l, lamb_h,
                                *, kernel=3, group=2):
    """Pure-JAX mirror of the PyTorch forward (NCHW)."""
    n, c, h, w = x.shape
    cpg = c // group
    pad = (kernel - 1) // 2
    ap = jnp.mean(x, axis=(2, 3))                                     # (n, c)
    filt = jnp.tanh(jnp.matmul(ap, conv_w.T,
                               precision=lax.Precision.HIGHEST))      # (n, g*k)
    filt = filt.reshape(n, group, kernel)
    f_per_c = jnp.repeat(filt, cpg, axis=1)                           # (n, c, k)
    xpad = jnp.pad(x, ((0, 0), (0, 0), (0, 0), (pad, pad)), mode="reflect")
    taps = jnp.stack([xpad[..., i:i + w] for i in range(kernel)], axis=2)
    out = jnp.sum(taps * f_per_c[:, :, :, None, None], axis=2)        # (n,c,h,w)
    gap = jnp.mean(x, axis=3, keepdims=True)                          # (n,c,h,1)
    ia = inside_all[None, :, None, None]
    out_low = (out * (ia + 1.0) - ia * gap) * lamb_l[None, :, None, None]
    out_high = x * (lamb_h[None, :, None, None] + 1.0)
    return out_low + out_high


if __name__ == "__main__":
    N, C, H, W = 2, 4, 16, 16
    kernel, group = 3, 2

    key = jax.random.PRNGKey(0)
    k1, k2, k3, k4, k5 = jax.random.split(key, 5)
    x = jax.random.normal(k1, (N, C, H, W), jnp.float32)
    # Module parameter shapes: conv (group*k, C, 1, 1) -> squeezed,
    # inside_all (C,1,1) -> squeezed, lamb_l / lamb_h (C,).
    conv_w = 0.1 * jax.random.normal(k2, (group * kernel, C), jnp.float32)
    inside_all = 0.1 * jax.random.normal(k3, (C,), jnp.float32)
    lamb_l = 0.1 * jax.random.normal(k4, (C,), jnp.float32)
    lamb_h = 0.1 * jax.random.normal(k5, (C,), jnp.float32)

    fn = jax.jit(spatial_strip_att_pallas, static_argnames=("kernel", "group"))
    out = fn(x, conv_w, inside_all, lamb_l, lamb_h, kernel=kernel, group=group)
    out = jax.block_until_ready(out)

    ref = spatial_strip_att_reference(x, conv_w, inside_all, lamb_l, lamb_h,
                                      kernel=kernel, group=group)
    assert out.shape == (N, C, H, W) and out.dtype == jnp.float32
    err = float(jnp.max(jnp.abs(out - ref)))
    assert jnp.allclose(out, ref, atol=1e-4, rtol=1e-4), err
    print("KERNEL_OK")
</pallas_src>

<mosaic_0001>
module attributes {stable_mosaic.version = 11 : i64} {
  func.func @_strip_att_kernel(%arg0: i32, %arg1: i32, %arg2: memref<1x4x256xf32, #tpu.memory_space<vmem>>, %arg3: memref<1x4x3xf32, #tpu.memory_space<vmem>>, %arg4: memref<4x3xf32, #tpu.memory_space<vmem>>, %arg5: memref<256x256xf32, #tpu.memory_space<vmem>>, %arg6: memref<1x4x256xf32, #tpu.memory_space<vmem>>) attributes {dimension_semantics = [#tpu.dimension_semantics<parallel>, #tpu.dimension_semantics<parallel>], iteration_bounds = array<i64: 2, 1>, scalar_prefetch = 0 : i64, scratch_operands = 0 : i64, tpu.core_type = #tpu.core_type<tc>, window_params = [{transform_indices = @transform_0, window_bounds = array<i64: 1, 4, 256>}, {transform_indices = @transform_1, window_bounds = array<i64: 1, 4, 3>}, {pipeline_mode = #tpu.pipeline_mode<synchronous>, transform_indices = @transform_2, window_bounds = array<i64: 4, 3>}, {pipeline_mode = #tpu.pipeline_mode<synchronous>, transform_indices = @transform_3, window_bounds = array<i64: 256, 256>}, {transform_indices = @transform_4, window_bounds = array<i64: 1, 4, 256>}]} {
    %c0 = arith.constant 0 : index
    %c0_0 = arith.constant 0 : index
    %c0_1 = arith.constant 0 : index
    %0 = vector.load %arg2[%c0, %c0_0, %c0_1] : memref<1x4x256xf32, #tpu.memory_space<vmem>>, vector<1x4x256xf32>
    %1 = vector.shape_cast %0 : vector<1x4x256xf32> to vector<4x256xf32>
    %c0_2 = arith.constant 0 : index
    %c0_3 = arith.constant 0 : index
    %c0_4 = arith.constant 0 : index
    %2 = vector.load %arg3[%c0_2, %c0_3, %c0_4] : memref<1x4x3xf32, #tpu.memory_space<vmem>>, vector<1x4x3xf32>
    %3 = vector.shape_cast %2 : vector<1x4x3xf32> to vector<4x3xf32>
    %c0_5 = arith.constant 0 : index
    %c0_6 = arith.constant 0 : index
    %4 = vector.load %arg4[%c0_5, %c0_6] : memref<4x3xf32, #tpu.memory_space<vmem>>, vector<4x3xf32>
    %5 = vector.extract_strided_slice %3 {offsets = [0, 0], sizes = [4, 1], strides = [1, 1]} : vector<4x3xf32> to vector<4x1xf32>
    %6 = vector.extract_strided_slice %3 {offsets = [0, 1], sizes = [4, 1], strides = [1, 1]} : vector<4x3xf32> to vector<4x1xf32>
    %7 = vector.extract_strided_slice %3 {offsets = [0, 2], sizes = [4, 1], strides = [1, 1]} : vector<4x3xf32> to vector<4x1xf32>
    %8 = vector.extract_strided_slice %4 {offsets = [0, 0], sizes = [4, 1], strides = [1, 1]} : vector<4x3xf32> to vector<4x1xf32>
    %9 = vector.extract_strided_slice %4 {offsets = [0, 1], sizes = [4, 1], strides = [1, 1]} : vector<4x3xf32> to vector<4x1xf32>
    %10 = vector.extract_strided_slice %4 {offsets = [0, 2], sizes = [4, 1], strides = [1, 1]} : vector<4x3xf32> to vector<4x1xf32>
    %c1_i32 = arith.constant 1 : i32
    %11 = tpu.dynamic_rotate %1 by %c1_i32 dim 1 : vector<4x256xf32>, i32 -> vector<4x256xf32>
    %c255_i32 = arith.constant 255 : i32
    %12 = tpu.dynamic_rotate %1 by %c255_i32 dim 1 : vector<4x256xf32>, i32 -> vector<4x256xf32>
    %13 = tpu.iota {dimensions = array<i32: 1>} : vector<4x256xi32>
    %c16_i32 = arith.constant 16 : i32
    %c0_i32 = arith.constant 0 : i32
    %14 = arith.cmpi eq, %c16_i32, %c0_i32 : i32
    %c1_i32_7 = arith.constant 1 : i32
    %15 = arith.select %14, %c1_i32_7, %c16_i32 : i32
    %16 = vector.broadcast %15 : i32 to vector<4x256xi32>
    %17 = arith.remsi %13, %16 : vector<4x256xi32>
    %c0_i32_8 = arith.constant 0 : i32
    %18 = vector.broadcast %c0_i32_8 : i32 to vector<4x256xi32>
    %19 = arith.cmpi ne, %17, %18 : vector<4x256xi32>
    %c0_i32_9 = arith.constant 0 : i32
    %20 = vector.broadcast %c0_i32_9 : i32 to vector<4x256xi32>
    %21 = arith.cmpi slt, %17, %20 : vector<4x256xi32>
    %c0_i32_10 = arith.constant 0 : i32
    %22 = arith.cmpi slt, %15, %c0_i32_10 : i32
    %23 = vector.broadcast %22 : i1 to vector<4x256xi1>
    %24 = vector.broadcast %23 : vector<4x256xi1> to vector<4x256xi1>
    %25 = arith.xori %21, %24 : vector<4x256xi1>
    %26 = arith.andi %25, %19 : vector<4x256xi1>
    %27 = vector.broadcast %15 : i32 to vector<4x256xi32>
    %28 = arith.addi %17, %27 : vector<4x256xi32>
    %29 = arith.select %26, %28, %17 : vector<4x256xi1>, vector<4x256xi32>
    %c0_i32_11 = arith.constant 0 : i32
    %30 = vector.broadcast %c0_i32_11 : i32 to vector<4x256xi32>
    %31 = arith.cmpi eq, %29, %30 : vector<4x256xi32>
    %32 = arith.select %31, %12, %11 : vector<4x256xi1>, vector<4x256xf32>
    %c15_i32 = arith.constant 15 : i32
    %33 = vector.broadcast %c15_i32 : i32 to vector<4x256xi32>
    %34 = arith.cmpi eq, %29, %33 : vector<4x256xi32>
    %35 = arith.select %34, %11, %12 : vector<4x256xi1>, vector<4x256xf32>
    %36 = vector.broadcast %5 : vector<4x1xf32> to vector<4x256xf32>
    %37 = arith.mulf %36, %32 : vector<4x256xf32>
    %38 = vector.broadcast %6 : vector<4x1xf32> to vector<4x256xf32>
    %39 = arith.mulf %38, %1 : vector<4x256xf32>
    %40 = arith.addf %37, %39 : vector<4x256xf32>
    %41 = vector.broadcast %7 : vector<4x1xf32> to vector<4x256xf32>
    %42 = arith.mulf %41, %35 : vector<4x256xf32>
    %43 = arith.addf %40, %42 : vector<4x256xf32>
    %c0_12 = arith.constant 0 : index
    %c0_13 = arith.constant 0 : index
    %44 = vector.load %arg5[%c0_12, %c0_13] : memref<256x256xf32, #tpu.memory_space<vmem>>, vector<256x256xf32>
    %cst = arith.constant dense<0.000000e+00> : vector<4x256xf32>
    %45 = tpu.matmul %1, %44, %cst {dimension_numbers = #tpu.dot_dimension_numbers<[1], [0], [0], [1], [0, 0, 1, 1], [], []>, precision = #tpu.contract_precision<fp32>} : vector<4x256xf32>, vector<256x256xf32>, vector<4x256xf32> -> vector<4x256xf32>
    %cst_14 = arith.constant 1.000000e+00 : f32
    %46 = vector.broadcast %cst_14 : f32 to vector<4x1xf32>
    %47 = arith.addf %8, %46 : vector<4x1xf32>
    %48 = vector.broadcast %47 : vector<4x1xf32> to vector<4x256xf32>
    %49 = arith.mulf %43, %48 : vector<4x256xf32>
    %50 = vector.broadcast %8 : vector<4x1xf32> to vector<4x256xf32>
    %51 = arith.mulf %50, %45 : vector<4x256xf32>
    %52 = arith.subf %49, %51 : vector<4x256xf32>
    %53 = vector.broadcast %9 : vector<4x1xf32> to vector<4x256xf32>
    %54 = arith.mulf %52, %53 : vector<4x256xf32>
    %cst_15 = arith.constant 1.000000e+00 : f32
    %55 = vector.broadcast %cst_15 : f32 to vector<4x1xf32>
    %56 = arith.addf %10, %55 : vector<4x1xf32>
    %57 = vector.broadcast %56 : vector<4x1xf32> to vector<4x256xf32>
    %58 = arith.mulf %1, %57 : vector<4x256xf32>
    %59 = arith.addf %54, %58 : vector<4x256xf32>
    %c0_16 = arith.constant 0 : index
    %c0_17 = arith.constant 0 : index
    %c0_18 = arith.constant 0 : index
    %60 = vector.load %arg6[%c0_16, %c0_17, %c0_18] : memref<1x4x256xf32, #tpu.memory_space<vmem>>, vector<1x4x256xf32>
    %61 = vector.shape_cast %60 : vector<1x4x256xf32> to vector<4x256xf32>
    %62 = vector.shape_cast %59 : vector<4x256xf32> to vector<1x4x256xf32>
    tpu.vector_store %arg6[%c0_16, %c0_17, %c0_18], %62 {strides = array<i32>} : memref<1x4x256xf32, #tpu.memory_space<vmem>>, vector<1x4x256xf32>,
    return
  }
  func.func @transform_0(%arg0: i32, %arg1: i32) -> (i32, i32, i32) {
    %c0_i32 = arith.constant 0 : i32
    %c0_i32_0 = arith.constant 0 : i32
    return %arg0, %c0_i32, %arg1 : i32, i32, i32
  }
  func.func @transform_1(%arg0: i32, %arg1: i32) -> (i32, i32, i32) {
    %c0_i32 = arith.constant 0 : i32
    %c0_i32_0 = arith.constant 0 : i32
    %c0_i32_1 = arith.constant 0 : i32
    return %arg0, %c0_i32, %c0_i32_0 : i32, i32, i32
  }
  func.func @transform_2(%arg0: i32, %arg1: i32) -> (i32, i32) {
    %c0_i32 = arith.constant 0 : i32
    %c0_i32_0 = arith.constant 0 : i32
    %c0_i32_1 = arith.constant 0 : i32
    return %c0_i32, %c0_i32_0 : i32, i32
  }
  func.func @transform_3(%arg0: i32, %arg1: i32) -> (i32, i32) {
    %c0_i32 = arith.constant 0 : i32
    %c0_i32_0 = arith.constant 0 : i32
    %c0_i32_1 = arith.constant 0 : i32
    return %c0_i32, %c0_i32_0 : i32, i32
  }
  func.func @transform_4(%arg0: i32, %arg1: i32) -> (i32, i32, i32) {
    %c0_i32 = arith.constant 0 : i32
    %c0_i32_0 = arith.constant 0 : i32
    return %arg0, %c0_i32, %arg1 : i32, i32, i32
  }
}

</mosaic_0001>

<bundles_post_ra>
// kernel: spatial_strip_att_pallas.1
= control target key start
LH: loop header
LB: loop body
LE: loop exit
PB: predicated region body
PF: predicated region fallthrough
CT: control target
= control target key end

     0   :  { %s2326_s15 = smov 0   ;;  %s2328_s16 = smov 0   ;;  %s3397_s0 = inlined_call_operand.vmem [shape: f32[2,4,256], index: 0, kind: input, shape index: {}]   ;;  %s3398_s1 = inlined_call_operand.vmem [shape: f32[2,4,3], index: 1, kind: input, shape index: {}]   ;;  %s3399_s2 = inlined_call_operand.vmem [shape: f32[4,3], index: 2, kind: input, shape index: {}]   ;;  %s3400_s3 = inlined_call_operand.vmem [shape: f32[256,256], index: 3, kind: input, shape index: {}]   ;;  %s3401_s4 = inlined_call_operand.vmem [shape: f32[2,4,256], index: 4, kind: output, shape index: {}]  }
   0x1   :  { %s2330_s17 = smov 0  }
   0x2 LB: > { %s26_s18 = sadd.s32 1, %s2289_s16  ;;  %p1828_p0 = scmp.ge.s32.totalorder %s2293_s17, 1  ;;  %s2293_s17 = sphi %s2330_s17, %s14_s17   ;;  %s2289_s16 = sphi %s2328_s16, %s3834_s16   ;;  %s2285_s15 = sphi %s2326_s15, %s3833_s15  }
   0x3   : > { %p28_p1 = scmp.ge.s32.totalorder %s26_s18, 2  ;;  %p192_p2 = scmp.lt.s32.totalorder %s2293_s17, 3 }
   0x5   : > { %s3836_s18 = smov (%p28_p1, %s26_s18), 0  ;;  %p193_p3 = pnand %p1828_p0, %p192_p2 }
   0x7   : > { %196 = sbr.rel (%p193_p3) target bundleno = 441 (0x1b9), region = 36 }
   0xe   : > { %v333_v0 = vld [vmem:[%s3400_s3 + $0x8] sm:$0xff]  ;;  %v335_v1 = vld [vmem:[%s3400_s3 + $0x18] sm:$0xff]  ;;  %v332_v2 = vld [vmem:[%s3400_s3] sm:$0xff]  ;;  %p231_p4 = scmp.lt.s32.totalorder %s2285_s15, 1  ;;  %s2297_s25 = smov 1  }
   0xf   : > { %v396_v3 = vand.u32 4294901760, %v333_v0  ;;  %v400_v4 = vand.u32 4294901760, %v335_v1  ;;  %v334_v5 = vld [vmem:[%s3400_s3 + $0x10] sm:$0xff]  ;;  %v398_v6 = vand.u32 4294901760, %v332_v2  ;;  %v337_v7 = vld [vmem:[%s3400_s3 + $0x28] sm:$0xff]  ;;  %v339_v8 = vld [vmem:[%s3400_s3 + $0x38] sm:$0xff] }
  0x10   : > { %v402_v9 = vand.u32 4294901760, %v334_v5  ;;  %v404_v10 = vand.u32 4294901760, %v337_v7  ;;  %v408_v11 = vand.u32 4294901760, %v339_v8  ;;  %v336_v12 = vld [vmem:[%s3400_s3 + $0x20] sm:$0xff]  ;;  %v338_v13 = vld [vmem:[%s3400_s3 + $0x30] sm:$0xff]  ;;  %v341_v14 = vld [vmem:[%s3400_s3 + $0x48] sm:$0xff] }
  0x11   : > { %v2373_v15 = vpack.c.bf16 %v400_v4, %v396_v3  ;;  %v343_v16 = vld [vmem:[%s3400_s3 + $0x58] sm:$0xff]  ;;  %v340_v17 = vld [vmem:[%s3400_s3 + $0x40] sm:$0xff]  ;;  %v342_v18 = vld [vmem:[%s3400_s3 + $0x50] sm:$0xff]  ;;  %v406_v23 = vand.u32 4294901760, %v336_v12  ;;  %v410_v24 = vand.u32 4294901760, %v338_v13  ;;  %v412_v25 = vand.u32 4294901760, %v341_v14 }
  0x12   : > { %v2384_v19 = vpack.c.bf16 %v402_v9, %v398_v6  ;;  %v2386_v20 = vpack.c.bf16 %v408_v11, %v404_v10  ;;  %v345_v21 = vld [vmem:[%s3400_s3 + $0x68] sm:$0xff]  ;;  %v347_v22 = vld [vmem:[%s3400_s3 + $0x78] sm:$0xff]  ;;  %v416_v26 = vand.u32 4294901760, %v343_v16  ;;  %v414_v27 = vand.u32 4294901760, %v340_v17  ;;  %v344_v32 = vld [vmem:[%s3400_s3 + $0x60] sm:$0xff]  ;;  %s3838_s15 = smov (!%p231_p4, %s2285_s15), 1 }
  0x13   : > { %3551 = vst [vmem:[#allocation2_spill] sm:$0xff] %v2373_v15  ;;  %1839 = vmatprep.subr.bf16.mxu1 %v2373_v15  ;;  %2031 = vmatprep.subr.bf16.mxu0 %v2373_v15  ;;  %v418_v28 = vand.u32 4294901760, %v342_v18  ;;  %v2400_v29 = vpack.c.bf16 %v410_v24, %v406_v23  ;;  %v420_v30 = vand.u32 4294901760, %v345_v21  ;;  %v424_v31 = vand.u32 4294901760, %v347_v22  ;;  %v346_v33 = vld [vmem:[%s3400_s3 + $0x70] sm:$0xff]  ;;  %v349_v35 = vld [vmem:[%s3400_s3 + $0x88] sm:$0xff] }
  0x14   : > { %3552 = vst [vmem:[#allocation3_spill] sm:$0xff] %v2384_v19  ;;  %3553 = vst [vmem:[#allocation4_spill] sm:$0xff] %v2386_v20  ;;  %1841 = vmatpush1.bf16.msra.mxu1 %v2384_v19  ;;  %2033 = vmatpush1.bf16.msra.mxu0 %v2384_v19  ;;  %v2408_v34 = vpack.c.bf16 %v416_v26, %v412_v25  ;;  %v351_v36 = vld [vmem:[%s3400_s3 + $0x98] sm:$0xff]  ;;  %v2416_v37 = vsub.f32 %v333_v0, %v396_v3  ;;  %v422_v43 = vand.u32 4294901760, %v344_v32  ;;  %v348_v45 = vld [vmem:[%s3400_s3 + $0x80] sm:$0xff]  ;;  %s1836_s13 = sshll.u32 %s3838_s15, 3 }
  0x15   : > { %1843 = vmatprep.subr.bf16.mxu1 %v2386_v20  ;;  %2035 = vmatprep.subr.bf16.mxu0 %v2386_v20  ;;  %3554 = vst [vmem:[#allocation5_spill] sm:$0xff] %v2400_v29  ;;  %v2418_v38 = vsub.f32 %v335_v1, %v400_v4  ;;  %v2420_v39 = vsub.f32 %v332_v2, %v398_v6  ;;  %v426_v44 = vand.u32 4294901760, %v346_v33  ;;  %v350_v46 = vld [vmem:[%s3400_s3 + $0x90] sm:$0xff]  ;;  %v428_v49 = vand.u32 4294901760, %v349_v35  ;;  %v353_v51 = vld [vmem:[%s3400_s3 + $0xa8] sm:$0xff]  ;;  %v355_v56 = vld [vmem:[%s3400_s3 + $0xb8] sm:$0xff]  ;;  %s2692_s24 = scalar_lea.vmem %s3397_s0, %s1836_s13  ;;  %s252_s30 = scalar_lea.vmem %s3401_s4, %s1836_s13 }
  0x16   : > { %3555 = vst [vmem:[#allocation6_spill] sm:$0xff] %v2408_v34  ;;  %v2422_v40 = vsub.f32 %v334_v5, %v402_v9  ;;  %v2424_v41 = vsub.f32 %v337_v7, %v404_v10  ;;  %v2428_v42 = vpack.c.bf16 %v418_v28, %v414_v27  ;;  %v2436_v47 = vsub.f32 %v339_v8, %v408_v11  ;;  %v352_v57 = vld [vmem:[%s3400_s3 + $0xa0] sm:$0xff]  ;;  %v354_v62 = vld [vmem:[%s3400_s3 + $0xb0] sm:$0xff]  ;;  %v357_v63 = vld [vmem:[%s3400_s3 + $0xc8] sm:$0xff]  ;;  %s1831_s20 = sshll.u32 %s3838_s15, 2  ;;  %s2299_s28 = smov 127  }
  0x17   : > { %3556 = vst [vmem:[#allocation7_spill] sm:$0xff] %v2420_v39  ;;  %v2440_v48 = vpack.c.bf16 %v424_v31, %v420_v30  ;;  %v432_v50 = vand.u32 4294901760, %v351_v36  ;;  %v2445_v52 = vsub.f32 %v336_v12, %v406_v23  ;;  %v2447_v53 = vsub.f32 %v338_v13, %v410_v24  ;;  %v359_v0 = vld [vmem:[%s3400_s3 + $0xd8] sm:$0xff]  ;;  %v356_v9 = vld [vmem:[%s3400_s3 + $0xc0] sm:$0xff]  ;;  %v358_v10 = vld [vmem:[%s3400_s3 + $0xd0] sm:$0xff]  ;;  %s243_s23 = scalar_lea.vmem %s3398_s1, %s1831_s20 }
  0x18   : > { %3557 = vst [vmem:[#allocation8_spill] sm:$0xff] %v2422_v40  ;;  %1845 = vmatpush1.bf16.msra.mxu1 %v2400_v29  ;;  %2037 = vmatpush1.bf16.msra.mxu0 %v2400_v29  ;;  %3558 = vst [vmem:[#allocation9_spill] sm:$0xff] %v2428_v42  ;;  %v2449_v54 = vsub.f32 %v341_v14, %v412_v25  ;;  %v2451_v55 = vsub.f32 %v343_v16, %v416_v26  ;;  %v430_v60 = vand.u32 4294901760, %v348_v45  ;;  %v361_v16 = vld [vmem:[%s3400_s3 + $0xe8] sm:$0xff]  ;;  %v372_v20 = vld [vmem:[%s3400_s3 + $0x140] sm:$0xff] }
  0x19   : > { %1847 = vmatprep.subr.bf16.mxu1 %v2408_v34  ;;  %2039 = vmatprep.subr.bf16.mxu0 %v2408_v34  ;;  %3559 = vst [vmem:[#allocation10_spill] sm:$0xff] %v2440_v48  ;;  %3560 = vst [vmem:[#allocation11_spill] sm:$0xff] %v2445_v52  ;;  %v2459_v58 = vsub.f32 %v340_v17, %v414_v27  ;;  %v2461_v59 = vsub.f32 %v342_v18, %v418_v28  ;;  %v434_v61 = vand.u32 4294901760, %v350_v46  ;;  %v363_v17 = vld [vmem:[%s3400_s3 + $0xf8] sm:$0xff]  ;;  %v360_v28 = vld [vmem:[%s3400_s3 + $0xe0] sm:$0xff] }
  0x1a   : > { %3561 = vst [vmem:[#allocation12_spill] sm:$0xff] %v2447_v53  ;;  %3562 = vst [vmem:[#allocation13_spill] sm:$0xff] %v2449_v54  ;;  %v2474_v1 = vsub.f32 %v345_v21, %v420_v30  ;;  %v2476_v2 = vsub.f32 %v347_v22, %v424_v31  ;;  %v2478_v3 = vpack.c.bf16 %v426_v44, %v422_v43  ;;  %v436_v4 = vand.u32 4294901760, %v353_v51  ;;  %v362_v30 = vld [vmem:[%s3400_s3 + $0xf0] sm:$0xff]  ;;  %v373_v34 = vld [vmem:[%s3400_s3 + $0x148] sm:$0xff] }
  0x1b   : > { %3563 = vst [vmem:[#allocation14_spill] sm:$0xff] %v2451_v55  ;;  %v2482_v5 = vsub.f32 %v344_v32, %v422_v43  ;;  %v2484_v6 = vsub.f32 %v346_v33, %v426_v44  ;;  %v2486_v7 = vpack.c.bf16 %v432_v50, %v428_v49  ;;  %v440_v8 = vand.u32 4294901760, %v355_v56  ;;  %v367_v43 = vld [vmem:[%s3400_s3 + $0x118] sm:$0xff] }
  0x1c   : > { %1849 = vmatpush1.bf16.msra.mxu1 %v2428_v42  ;;  %2041 = vmatpush1.bf16.msra.mxu0 %v2428_v42  ;;  %3564 = vst [vmem:[#allocation15_spill] sm:$0xff] %v2474_v1  ;;  %3565 = vst [vmem:[#allocation16_spill] sm:$0xff] %v2476_v2  ;;  %v438_v11 = vand.u32 4294901760, %v352_v57  ;;  %v442_v12 = vand.u32 4294901760, %v354_v62  ;;  %v444_v13 = vand.u32 4294901760, %v357_v63  ;;  %v448_v14 = vand.u32 4294901760, %v359_v0 }
  0x1d   : > { %3566 = vst [vmem:[#allocation17_spill] sm:$0xff] %v2478_v3  ;;  %1851 = vmatprep.subr.bf16.mxu1 %v2440_v48  ;;  %2043 = vmatprep.subr.bf16.mxu0 %v2440_v48  ;;  %3567 = vst [vmem:[#allocation18_spill] sm:$0xff] %v2482_v5  ;;  %v2500_v18 = vsub.f32 %v349_v35, %v428_v49  ;;  %v2502_v21 = vsub.f32 %v351_v36, %v432_v50  ;;  %v446_v26 = vand.u32 4294901760, %v356_v9  ;;  %v365_v36 = vld [vmem:[%s3400_s3 + $0x108] sm:$0xff]  ;;  %v364_v50 = vld [vmem:[%s3400_s3 + $0x100] sm:$0xff] }
  0x1e   : > { %3568 = vst [vmem:[#allocation19_spill] sm:$0xff] %v2484_v6  ;;  %3569 = vst [vmem:[#allocation20_spill] sm:$0xff] %v2486_v7  ;;  %v2504_v22 = vpack.c.bf16 %v434_v61, %v430_v60  ;;  %v2506_v23 = vsub.f32 %v348_v45, %v430_v60  ;;  %v2510_v24 = vsub.f32 %v350_v46, %v434_v61  ;;  %v450_v27 = vand.u32 4294901760, %v358_v10 }
  0x1f   : > { %3570 = vst [vmem:[#allocation21_spill] sm:$0xff] %v2500_v18  ;;  %3571 = vst [vmem:[#allocation22_spill] sm:$0xff] %v2502_v21  ;;  %v2512_v25 = vsub.f32 %v353_v51, %v436_v4  ;;  %v2522_v31 = vpack.c.bf16 %v440_v8, %v436_v4  ;;  %v2524_v32 = vsub.f32 %v355_v56, %v440_v8  ;;  %v452_v33 = vand.u32 4294901760, %v361_v16  ;;  %v366_v4 = vld [vmem:[%s3400_s3 + $0x110] sm:$0xff] }
  0x20   : > { %3572 = vst [vmem:[#allocation23_spill] sm:$0xff] %v2504_v22  ;;  %3573 = vst [vmem:[#allocation24_spill] sm:$0xff] %v2506_v23  ;;  %1853 = vmatpush1.bf16.msra.mxu1 %v2478_v3  ;;  %2045 = vmatpush1.bf16.msra.mxu0 %v2478_v3  ;;  %v456_v35 = vand.u32 4294901760, %v363_v17  ;;  %v2532_v44 = vpack.c.bf16 %v442_v12, %v438_v11  ;;  %v2534_v45 = vsub.f32 %v352_v57, %v438_v11  ;;  %v369_v57 = vld [vmem:[%s3400_s3 + $0x128] sm:$0xff] }
  0x21   : > { %3574 = vst [vmem:[#allocation25_spill] sm:$0xff] %v2510_v24  ;;  %3575 = vst [vmem:[#allocation26_spill] sm:$0xff] %v2512_v25  ;;  %1855 = vmatprep.subr.bf16.mxu1 %v2486_v7  ;;  %2047 = vmatprep.subr.bf16.mxu0 %v2486_v7  ;;  %v2536_v46 = vsub.f32 %v354_v62, %v442_v12  ;;  %v2538_v49 = vpack.c.bf16 %v448_v14, %v444_v13  ;;  %v454_v60 = vand.u32 4294901760, %v360_v28  ;;  %v371_v62 = vld [vmem:[%s3400_s3 + $0x138] sm:$0xff]  ;;  %v368_v12 = vld [vmem:[%s3400_s3 + $0x120] sm:$0xff] }
  0x22   : > { %3576 = vst [vmem:[#allocation27_spill] sm:$0xff] %v2522_v31  ;;  %3577 = vst [vmem:[#allocation28_spill] sm:$0xff] %v2524_v32  ;;  %v2543_v51 = vsub.f32 %v357_v63, %v444_v13  ;;  %v2545_v56 = vsub.f32 %v359_v0, %v448_v14  ;;  %v458_v61 = vand.u32 4294901760, %v362_v30  ;;  %v2558_v63 = vpack.c.bf16 %v450_v27, %v446_v26  ;;  %v370_v13 = vld [vmem:[%s3400_s3 + $0x130] sm:$0xff] }
  0x23   : > { %3578 = vst [vmem:[#allocation29_spill] sm:$0xff] %v2532_v44  ;;  %3579 = vst [vmem:[#allocation30_spill] sm:$0xff] %v2534_v45  ;;  %v2560_v0 = vsub.f32 %v356_v9, %v446_v26  ;;  %v460_v8 = vand.u32 4294901760, %v365_v36  ;;  %v464_v11 = vand.u32 4294901760, %v367_v43  ;;  %v2570_v14 = vsub.f32 %v358_v10, %v450_v27  ;;  %v375_v10 = vld [vmem:[%s3400_s3 + $0x158] sm:$0xff] }
  0x24   : > { %3580 = vst [vmem:[#allocation31_spill] sm:$0xff] %v2538_v49  ;;  %3581 = vst [vmem:[#allocation32_spill] sm:$0xff] %v2543_v51  ;;  %1857 = vmatpush1.bf16.msra.mxu1 %v2504_v22  ;;  %2049 = vmatpush1.bf16.msra.mxu0 %v2504_v22  ;;  %v2572_v22 = vpack.c.bf16 %v456_v35, %v452_v33  ;;  %v2574_v9 = vsub.f32 %v361_v16, %v452_v33  ;;  %v462_v26 = vand.u32 4294901760, %v364_v50 }
  0x25   : > { %3582 = vst [vmem:[#allocation33_spill] sm:$0xff] %v2545_v56  ;;  %3583 = vst [vmem:[#allocation34_spill] sm:$0xff] %v2558_v63  ;;  %1859 = vmatprep.subr.bf16.mxu1 %v2522_v31  ;;  %2051 = vmatprep.subr.bf16.mxu0 %v2522_v31  ;;  %v2577_v7 = vsub.f32 %v363_v17, %v456_v35  ;;  %v466_v3 = vand.u32 4294901760, %v366_v4  ;;  %v468_v48 = vand.u32 4294901760, %v369_v57  ;;  %v472_v42 = vand.u32 4294901760, %v371_v62 }
  0x26   : > { %3584 = vst [vmem:[#allocation35_spill] sm:$0xff] %v2560_v0  ;;  %3585 = vst [vmem:[#allocation36_spill] sm:$0xff] %v2570_v14  ;;  %v2585_v27 = vpack.c.bf16 %v458_v61, %v454_v60  ;;  %v2587_v31 = vsub.f32 %v360_v28, %v454_v60  ;;  %v470_v16 = vand.u32 4294901760, %v368_v12  ;;  %v474_v17 = vand.u32 4294901760, %v370_v13  ;;  %v374_v28 = vld [vmem:[%s3400_s3 + $0x150] sm:$0xff] }
  0x27   : > { %3586 = vst [vmem:[#allocation37_spill] sm:$0xff] %v2572_v22  ;;  %3587 = vst [vmem:[#allocation38_spill] sm:$0xff] %v2574_v9  ;;  %v2591_v33 = vsub.f32 %v362_v30, %v458_v61  ;;  %v2593_v35 = vpack.c.bf16 %v464_v11, %v460_v8  ;;  %v2595_v29 = vsub.f32 %v365_v36, %v460_v8  ;;  %v476_v61 = vand.u32 4294901760, %v373_v34 }
  0x28   : > { %3588 = vst [vmem:[#allocation39_spill] sm:$0xff] %v2577_v7  ;;  %3589 = vst [vmem:[#allocation40_spill] sm:$0xff] %v2585_v27  ;;  %1861 = vmatpush1.bf16.msra.mxu1 %v2532_v44  ;;  %2053 = vmatpush1.bf16.msra.mxu0 %v2532_v44  ;;  %v2605_v60 = vsub.f32 %v367_v43, %v464_v11  ;;  %v2607_v30 = vsub.f32 %v364_v50, %v462_v26  ;;  %v480_v44 = vand.u32 4294901760, %v375_v10  ;;  %v377_v43 = vld [vmem:[%s3400_s3 + $0x168] sm:$0xff]  ;;  %v379_v50 = vld [vmem:[%s3400_s3 + $0x178] sm:$0xff] }
  0x29   : > { %3590 = vst [vmem:[#allocation41_spill] sm:$0xff] %v2587_v31  ;;  %3591 = vst [vmem:[#allocation42_spill] sm:$0xff] %v2591_v33  ;;  %1863 = vmatprep.subr.bf16.mxu1 %v2538_v49  ;;  %2055 = vmatprep.subr.bf16.mxu0 %v2538_v49  ;;  %v2614_v36 = vpack.c.bf16 %v466_v3, %v462_v26  ;;  %v2616_v8 = vsub.f32 %v366_v4, %v466_v3  ;;  %v376_v11 = vld [vmem:[%s3400_s3 + $0x160] sm:$0xff]  ;;  %v478_v4 = vand.u32 4294901760, %v372_v20 }
  0x2a   : > { %3592 = vst [vmem:[#allocation43_spill] sm:$0xff] %v2593_v35  ;;  %3593 = vst [vmem:[#allocation44_spill] sm:$0xff] %v2595_v29  ;;  %v2618_v19 = vpack.c.bf16 %v472_v42, %v468_v48  ;;  %v2620_v15 = vsub.f32 %v369_v57, %v468_v48  ;;  %v2631_v26 = vsub.f32 %v371_v62, %v472_v42  ;;  %v482_v49 = vand.u32 4294901760, %v374_v28  ;;  %v378_v48 = vld [vmem:[%s3400_s3 + $0x170] sm:$0xff]  ;;  %v381_v57 = vld [vmem:[%s3400_s3 + $0x188] sm:$0xff] }
  0x2b   : > { %3594 = vst [vmem:[#allocation45_spill] sm:$0xff] %v2605_v60  ;;  %3595 = vst [vmem:[#allocation46_spill] sm:$0xff] %v2607_v30  ;;  %v2633_v3 = vpack.c.bf16 %v474_v17, %v470_v16  ;;  %v2646_v42 = vsub.f32 %v368_v12, %v470_v16  ;;  %v2648_v62 = vsub.f32 %v370_v13, %v474_v17  ;;  %v382_v30 = vld [vmem:[%s3400_s3 + $0x190] sm:$0xff]  ;;  %v484_v13 = vand.u32 4294901760, %v377_v43  ;;  %v387_v17 = vld [vmem:[%s3400_s3 + $0x1b8] sm:$0xff] }
  0x2c   : > { %3596 = vst [vmem:[#allocation47_spill] sm:$0xff] %v2614_v36  ;;  %3597 = vst [vmem:[#allocation48_spill] sm:$0xff] %v2616_v8  ;;  %1865 = vmatpush1.bf16.msra.mxu1 %v2558_v63  ;;  %2057 = vmatpush1.bf16.msra.mxu0 %v2558_v63  ;;  %v380_v8 = vld [vmem:[%s3400_s3 + $0x180] sm:$0xff]  ;;  %v2660_v60 = vpack.c.bf16 %v480_v44, %v476_v61  ;;  %v2662_v12 = vsub.f32 %v375_v10, %v480_v44  ;;  %v488_v16 = vand.u32 4294901760, %v379_v50 }
  0x2d   : > { %3598 = vst [vmem:[#allocation49_spill] sm:$0xff] %v2618_v19  ;;  %3599 = vst [vmem:[#allocation50_spill] sm:$0xff] %v2620_v15  ;;  %v383_v15 = vld [vmem:[%s3400_s3 + $0x198] sm:$0xff]  ;;  %1867 = vmatprep.subr.bf16.mxu1 %v2572_v22  ;;  %2059 = vmatprep.subr.bf16.mxu0 %v2572_v22  ;;  %v486_v63 = vand.u32 4294901760, %v376_v11  ;;  %v2673_v44 = vsub.f32 %v372_v20, %v478_v4  ;;  %v494_v10 = vand.u32 4294901760, %v380_v8  ;;  %v504_v31 = vand.u32 4294901760, %v387_v17 }
  0x2e   : > { %3600 = vst [vmem:[#allocation51_spill] sm:$0xff] %v2631_v26  ;;  %3601 = vst [vmem:[#allocation52_spill] sm:$0xff] %v2633_v3  ;;  %v2650_v26 = vsub.f32 %v373_v34, %v476_v61  ;;  %v385_v34 = vld [vmem:[%s3400_s3 + $0x1a8] sm:$0xff]  ;;  %v496_v22 = vand.u32 4294901760, %v383_v15  ;;  %v2671_v61 = vpack.c.bf16 %v482_v49, %v478_v4  ;;  %v2679_v29 = vsub.f32 %v377_v43, %v484_v13  ;;  %v384_v7 = vld [vmem:[%s3400_s3 + $0x1a0] sm:$0xff] }
  0x2f   : > { %3602 = vst [vmem:[#allocation53_spill] sm:$0xff] %v2646_v42  ;;  %3603 = vst [vmem:[#allocation54_spill] sm:$0xff] %v2648_v62  ;;  %v492_v62 = vand.u32 4294901760, %v381_v57  ;;  %v2677_v42 = vsub.f32 %v374_v28, %v482_v49  ;;  %v500_v33 = vand.u32 4294901760, %v385_v34  ;;  %v386_v20 = vld [vmem:[%s3400_s3 + $0x1b0] sm:$0xff]  ;;  %v2696_v49 = vpack.c.bf16 %v488_v16, %v484_v13  ;;  %v391_v13 = vld [vmem:[%s3400_s3 + $0x1d8] sm:$0xff] }
  0x30   : > { %3604 = vst [vmem:[#allocation55_spill] sm:$0xff] %v2650_v26  ;;  %3605 = vst [vmem:[#allocation56_spill] sm:$0xff] %v2660_v60  ;;  %v490_v26 = vand.u32 4294901760, %v378_v48  ;;  %1869 = vmatpush1.bf16.msra.mxu1 %v2585_v27  ;;  %2061 = vmatpush1.bf16.msra.mxu0 %v2585_v27  ;;  %v2698_v28 = vsub.f32 %v379_v50, %v488_v16  ;;  %v2700_v43 = vsub.f32 %v376_v11, %v486_v63 }
  0x31   : > { %3606 = vst [vmem:[#allocation57_spill] sm:$0xff] %v2662_v12  ;;  %3607 = vst [vmem:[#allocation58_spill] sm:$0xff] %v2671_v61  ;;  %v498_v12 = vand.u32 4294901760, %v382_v30  ;;  %1871 = vmatprep.subr.bf16.mxu1 %v2593_v35  ;;  %2063 = vmatprep.subr.bf16.mxu0 %v2593_v35  ;;  %v2716_v50 = vsub.f32 %v383_v15, %v496_v22  ;;  %v506_v16 = vand.u32 4294901760, %v386_v20 }
  0x32   : > { %3608 = vst [vmem:[#allocation59_spill] sm:$0xff] %v2673_v44  ;;  %3609 = vst [vmem:[#allocation60_spill] sm:$0xff] %v2677_v42  ;;  %v2702_v4 = vpack.c.bf16 %v490_v26, %v486_v63  ;;  %v2704_v27 = vsub.f32 %v378_v48, %v490_v26  ;;  %v2708_v42 = vsub.f32 %v381_v57, %v492_v62  ;;  %v389_v44 = vld [vmem:[%s3400_s3 + $0x1c8] sm:$0xff]  ;;  %v502_v63 = vand.u32 4294901760, %v384_v7  ;;  %v388_v26 = vld [vmem:[%s3400_s3 + $0x1c0] sm:$0xff] }
  0x33   : > { %3610 = vst [vmem:[#allocation61_spill] sm:$0xff] %v2679_v29  ;;  %3611 = vst [vmem:[#allocation62_spill] sm:$0xff] %v2696_v49  ;;  %v2706_v29 = vpack.c.bf16 %v496_v22, %v492_v62  ;;  %v2718_v11 = vpack.c.bf16 %v498_v12, %v494_v10  ;;  %v390_v48 = vld [vmem:[%s3400_s3 + $0x1d0] sm:$0xff]  ;;  %v2727_v57 = vld [vmem:[%s2692_s24] sm:$0xff]  ;;  %v2731_v15 = vsub.f32 %v380_v8, %v494_v10 }
  0x34   : > { %3612 = vst [vmem:[#allocation63_spill] sm:$0xff] %v2698_v28  ;;  %3613 = vst [vmem:[#allocation64_spill] sm:$0xff] %v2700_v43  ;;  %1873 = vmatpush1.bf16.msra.mxu1 %v2614_v36  ;;  %2065 = vmatpush1.bf16.msra.mxu0 %v2614_v36  ;;  %v2733_v22 = vsub.f32 %v382_v30, %v498_v12  ;;  %v2735_v62 = vpack.c.bf16 %v504_v31, %v500_v33  ;;  %v510_v28 = vand.u32 4294901760, %v388_v26  ;;  %v393_v30 = vld [vmem:[%s3400_s3 + $0x1e8] sm:$0xff]  ;;  %v395_v8 = vld [vmem:[%s3400_s3 + $0x1f8] sm:$0xff] }
  0x35   : > { %3614 = vst [vmem:[#allocation65_spill] sm:$0xff] %v2702_v4  ;;  %3615 = vst [vmem:[#allocation66_spill] sm:$0xff] %v2704_v27  ;;  %1875 = vmatprep.subr.bf16.mxu1 %v2618_v19  ;;  %2067 = vmatprep.subr.bf16.mxu0 %v2618_v19  ;;  %v2739_v35 = vsub.f32 %v385_v34, %v500_v33  ;;  %v512_v27 = vand.u32 4294901760, %v391_v13  ;;  %v2743_v43 = vsub.f32 %v384_v7, %v502_v63 }
  0x36   : > { %3616 = vst [vmem:[#allocation67_spill] sm:$0xff] %v2706_v29  ;;  %3617 = vst [vmem:[#allocation68_spill] sm:$0xff] %v2708_v42  ;;  %v508_v42 = vand.u32 4294901760, %v389_v44  ;;  %v514_v36 = vand.u32 4294901760, %v390_v48  ;;  %v2753_v33 = vcombine.high %v2727_v57, %v2727_v57  ;;  %v2760_v34 = vand.u32 4294901760, %v2727_v57 }
  0x37   : > { %3618 = vst [vmem:[#allocation69_spill] sm:$0xff] %v2716_v50  ;;  %3619 = vst [vmem:[#allocation70_spill] sm:$0xff] %v2718_v11  ;;  %v2741_v50 = vsub.f32 %v387_v17, %v504_v31  ;;  %v2755_v31 = vpack.c.bf16 %v506_v16, %v502_v63  ;;  %v2764_v17 = vsub.f32 %v386_v20, %v506_v16  ;;  %v549_v63 = vand.u32 4294901760, %v2420_v39  ;;  %v392_v16 = vld [vmem:[%s3400_s3 + $0x1e0] sm:$0xff] }
  0x38   : > { %3620 = vst [vmem:[#allocation71_spill] sm:$0xff] %v2727_v57  ;;  %3621 = vst [vmem:[#allocation72_spill] sm:$0xff] %v2731_v15  ;;  %1877 = vmatpush1.bf16.msra.mxu1 %v2633_v3  ;;  %2069 = vmatpush1.bf16.msra.mxu0 %v2633_v3  ;;  %v2766_v10 = vsub.f32 %v389_v44, %v508_v42  ;;  %v2769_v19 = vand.u32 4294901760, %v2753_v33  ;;  %v2774_v7 = vpack.c.bf16 %v512_v27, %v508_v42 }
  0x39   : > { %3622 = vst [vmem:[#allocation73_spill] sm:$0xff] %v2733_v22  ;;  %3623 = vst [vmem:[#allocation74_spill] sm:$0xff] %v2735_v62  ;;  %1879 = vmatprep.subr.bf16.mxu1 %v2660_v60  ;;  %2071 = vmatprep.subr.bf16.mxu0 %v2660_v60  ;;  %v516_v12 = vand.u32 4294901760, %v393_v30  ;;  %v2777_v3 = vsub.f32 %v391_v13, %v512_v27  ;;  %v2779_v20 = vpack.c.bf16 %v514_v36, %v510_v28  ;;  %v394_v60 = vld [vmem:[%s3400_s3 + $0x1f0] sm:$0xff] }
  0x3a   : > { %3624 = vst [vmem:[#allocation75_spill] sm:$0xff] %v2739_v35  ;;  %3625 = vst [vmem:[#allocation76_spill] sm:$0xff] %v2741_v50  ;;  %v561_v50 = vand.u32 4294901760, %v2422_v40  ;;  %v2781_v44 = vsub.f32 %v388_v26, %v510_v28  ;;  %v2790_v42 = vsub.f32 %v390_v48, %v514_v36  ;;  %v3639_v27 = vand.u32 4294901760, %v2416_v37 }
  0x3b   : > { %3626 = vst [vmem:[#allocation77_spill] sm:$0xff] %v2743_v43  ;;  %3627 = vst [vmem:[#allocation78_spill] sm:$0xff] %v2753_v33  ;;  %v520_v43 = vand.u32 4294901760, %v395_v8  ;;  %v3640_v28 = vand.u32 4294901760, %v2418_v38  ;;  %v2807_v36 = vsub.f32 %v393_v30, %v516_v12 }
  0x3c   : > { %3628 = vst [vmem:[#allocation79_spill] sm:$0xff] %v2755_v31  ;;  %3629 = vst [vmem:[#allocation80_spill] sm:$0xff] %v2760_v34  ;;  %v544_v13 = vsub.f32 %v2416_v37, %v3639_v27  ;;  %1881 = vmatpush1.bf16.msra.mxu1 %v2671_v61  ;;  %2073 = vmatpush1.bf16.msra.mxu0 %v2671_v61  ;;  %v567_v27 = vand.u32 4294901760, %v2424_v41  ;;  %v522_v61 = vand.u32 4294901760, %v394_v60 }
  0x3d   : > { %3630 = vst [vmem:[#allocation81_spill] sm:$0xff] %v2764_v17  ;;  %3631 = vst [vmem:[#allocation82_spill] sm:$0xff] %v2766_v10  ;;  %v2788_v10 = vsub.f32 %v2753_v33, %v2769_v19  ;;  %v556_v26 = vsub.f32 %v2418_v38, %v3640_v28  ;;  %v550_v33 = vsub.f32 %v2420_v39, %v549_v63  ;;  %1883 = vmatprep.subr.bf16.mxu1 %v2696_v49 }
  0x3e   : > { %3632 = vst [vmem:[#allocation83_spill] sm:$0xff] %v2769_v19  ;;  %3633 = vst [vmem:[#allocation84_spill] sm:$0xff] %v2774_v7  ;;  %2075 = vmatprep.subr.bf16.mxu0 %v2696_v49  ;;  %v2814_v28 = vpack.c.bf16 %v520_v43, %v516_v12  ;;  %v585_v39 = vand.u32 4294901760, %v2447_v53  ;;  %v545_v17 = vand.u32 4294901760, %v544_v13  ;;  %v591_v13 = vand.u32 4294901760, %v2449_v54 }
  0x3f   : > { %3634 = vst [vmem:[#allocation85_spill] sm:$0xff] %v2777_v3  ;;  %3635 = vst [vmem:[#allocation86_spill] sm:$0xff] %v2779_v20  ;;  %v526_v48 = vand.u32 4294901760, %v2788_v10  ;;  %v2821_v3 = vsub.f32 %v395_v8, %v520_v43  ;;  %v557_v35 = vand.u32 4294901760, %v556_v26  ;;  %v551_v22 = vand.u32 4294901760, %v550_v33 }
  0x40   : > { %3636 = vst [vmem:[#allocation87_spill] sm:$0xff] %v2781_v44  ;;  %3637 = vst [vmem:[#allocation88_spill] sm:$0xff] %v2788_v10  ;;  %v2803_v44 = vsub.f32 %v2727_v57, %v2760_v34  ;;  %v518_v34 = vand.u32 4294901760, %v392_v16  ;;  %v562_v57 = vsub.f32 %v2422_v40, %v561_v50  ;;  %1885 = vmatpush1.bf16.msra.mxu1 %v2702_v4  ;;  %2077 = vmatpush1.bf16.msra.mxu0 %v2702_v4 }
  0x41   : > { %3638 = vst [vmem:[#allocation89_spill] sm:$0xff] %v2790_v42  ;;  %3642 = vst [vmem:[#allocation91_spill] sm:$0xff] %v2807_v36  ;;  %v579_v42 = vand.u32 4294901760, %v2436_v47  ;;  %v527_v30 = vsub.f32 %v2788_v10, %v526_v48  ;;  %1268 = vmatprep.mubr.f32.mxu0 %v526_v48  ;;  %v573_v36 = vand.u32 4294901760, %v2445_v52  ;;  %v568_v48 = vsub.f32 %v2424_v41, %v567_v27 }
  0x42   : > { %3641 = vst [vmem:[#allocation90_spill] sm:$0xff] %v2803_v44  ;;  %3643 = vst [vmem:[#allocation92_spill] sm:$0xff] %v2814_v28  ;;  %v2826_v49 = vsub.f32 %v392_v16, %v518_v34  ;;  %1887 = vmatprep.subr.bf16.mxu1 %v2706_v29  ;;  %2079 = vmatprep.subr.bf16.mxu0 %v2706_v29  ;;  %v563_v43 = vand.u32 4294901760, %v562_v57  ;;  %v603_v26 = vand.u32 4294901760, %v2451_v55  ;;  %v3647_v29 = vand.u32 4294901760, %v2416_v37 }
  0x43   : > { %v528_v40 = vand.u32 4294901760, %v527_v30  ;;  %v580_v8 = vsub.f32 %v2436_v47, %v579_v42  ;;  %v2834_v12 = vpack.c.bf16 %v522_v61, %v518_v34  ;;  %v2836_v4 = vsub.f32 %v394_v60, %v522_v61 }
  0x44   : > { %3644 = vst [vmem:[#allocation93_spill] sm:$0xff] %v2826_v49  ;;  %v574_v33 = vsub.f32 %v2445_v52, %v573_v36  ;;  %v586_v16 = vsub.f32 %v2447_v53, %v585_v39  ;;  %v2840_v30 = vpack.c.bf16 %v557_v35, %v545_v17  ;;  %v3648_v57 = vand.u32 4294901760, %v2418_v38  ;;  %1889 = vmatpush1.bf16.msra.mxu1 %v2718_v11 }
  0x45   : > { %3645 = vst [vmem:[#allocation94_spill] sm:$0xff] %v2834_v12  ;;  %3646 = vst [vmem:[#allocation95_spill] sm:$0xff] %v2836_v4  ;;  %529 = vmatprep.mubr.f32.mxu1 %v528_v40  ;;  %v3649_v49 = vand.u32 4294901760, %v2803_v44  ;;  %v2853_v60 = vpack.c.bf16 %v561_v50, %v549_v63  ;;  %2081 = vmatpush1.bf16.msra.mxu0 %v2718_v11  ;;  %v592_v40 = vsub.f32 %v2449_v54, %v591_v13 }
  0x46   : > { %v2846_v10 = vpack.c.bf16 %v3648_v57, %v3647_v29  ;;  %v604_v35 = vsub.f32 %v2451_v55, %v603_v26  ;;  %v597_v61 = vand.u32 4294901760, %v2459_v58  ;;  %v609_v29 = vand.u32 4294901760, %v2461_v59  ;;  %1891 = vmatprep.subr.bf16.mxu1 %v2735_v62  ;;  %2083 = vmatprep.subr.bf16.mxu0 %v2735_v62 }
  0x47   : > { %v2851_v34 = vsub.f32 %v2803_v44, %v3649_v49  ;;  %v2863_v49 = vpack.c.bf16 %v563_v43, %v551_v22  ;;  %v569_v50 = vand.u32 4294901760, %v568_v48  ;;  %v581_v17 = vand.u32 4294901760, %v580_v8 }
  0x48   : > { %v2865_v63 = vpack.c.bf16 %v579_v42, %v567_v27  ;;  %v575_v57 = vand.u32 4294901760, %v574_v33  ;;  %v587_v11 = vand.u32 4294901760, %v586_v16  ;;  %v615_v4 = vand.u32 4294901760, %v2474_v1  ;;  %1893 = vmatpush1.bf16.msra.mxu1 %v2755_v31 }
  0x49   : > { %v627_v55 = vand.u32 4294901760, %v2476_v2  ;;  %v534_v54 = vand.u32 4294901760, %v2851_v34  ;;  %v2870_v53 = vpack.c.bf16 %v585_v39, %v573_v36  ;;  %v621_v52 = vand.u32 4294901760, %v2482_v5  ;;  %2085 = vmatpush1.bf16.msra.mxu0 %v2755_v31  ;;  %1895 = vmatprep.subr.bf16.mxu1 %v2774_v7 }
  0x4a   : > { %v633_v62 = vand.u32 4294901760, %v2484_v6  ;;  %v593_v22 = vand.u32 4294901760, %v592_v40  ;;  %v605_v42 = vand.u32 4294901760, %v604_v35  ;;  %v598_v27 = vsub.f32 %v2459_v58, %v597_v61  ;;  %2087 = vmatprep.subr.bf16.mxu0 %v2774_v7 }
  0x4b   : > { %v610_v48 = vsub.f32 %v2461_v59, %v609_v29  ;;  %v1906_v39 = vpack.c.bf16 %v581_v17, %v569_v50  ;;  %v2880_v36 = vpack.c.bf16 %v603_v26, %v591_v13  ;;  %v639_v43 = vand.u32 4294901760, %v2500_v18 }
  0x4c   : > { %v651_v8 = vand.u32 4294901760, %v2502_v21  ;;  %v2884_v33 = vpack.c.bf16 %v587_v11, %v575_v57  ;;  %v616_v16 = vsub.f32 %v2474_v1, %v615_v4  ;;  %v628_v34 = vsub.f32 %v2476_v2, %v627_v55  ;;  %1897 = vmatpush1.bf16.msra.mxu1 %v2779_v20  ;;  %v3714_v1 = vld [vmem:[#allocation61_spill] sm:$0xff] }
  0x4d   : > { %v645_v40 = vand.u32 4294901760, %v2506_v23  ;;  %v2889_v35 = vpack.c.bf16 %v609_v29, %v597_v61  ;;  %v622_v31 = vsub.f32 %v2482_v5, %v621_v52  ;;  %v634_v50 = vsub.f32 %v2484_v6, %v633_v62  ;;  %2089 = vmatpush1.bf16.msra.mxu0 %v2779_v20  ;;  %1899 = vmatprep.subr.bf16.mxu1 %v2814_v28 }
  0x4e   : > { %v657_v13 = vand.u32 4294901760, %v2510_v24  ;;  %v2896_v11 = vpack.c.bf16 %v605_v42, %v593_v22  ;;  %v599_v26 = vand.u32 4294901760, %v598_v27  ;;  %v611_v17 = vand.u32 4294901760, %v610_v48  ;;  %2091 = vmatprep.subr.bf16.mxu0 %v2814_v28 }
  0x4f   : > { %v2898_v57 = vpack.c.bf16 %v627_v55, %v615_v4  ;;  %v640_v61 = vsub.f32 %v2500_v18, %v639_v43  ;;  %v652_v29 = vsub.f32 %v2502_v21, %v651_v8  ;;  %v663_v7 = vand.u32 4294901760, %v2512_v25 }
  0x50   : > { %v675_v6 = vand.u32 4294901760, %v2524_v32  ;;  %v617_v5 = vand.u32 4294901760, %v616_v16  ;;  %v629_v20 = vand.u32 4294901760, %v628_v34  ;;  %v646_v22 = vsub.f32 %v2506_v23, %v645_v40  ;;  %1901 = vmatpush1.bf16.msra.mxu1 %v2834_v12 }
  0x51   : > { %v658_v42 = vsub.f32 %v2510_v24, %v657_v13  ;;  %v623_v55 = vand.u32 4294901760, %v622_v31  ;;  %v635_v4 = vand.u32 4294901760, %v634_v50  ;;  %v669_v27 = vand.u32 4294901760, %v2534_v45  ;;  %2093 = vmatpush1.bf16.msra.mxu0 %v2834_v12  ;;  %1903 = vmatprep.subr.bf16.mxu1 %v2840_v30 }
  0x52   : > { %v681_v48 = vand.u32 4294901760, %v2536_v46  ;;  %v1912_v28 = vpack.c.bf16 %v611_v17, %v599_v26  ;;  %v2912_v21 = vpack.c.bf16 %v633_v62, %v621_v52  ;;  %v687_v16 = vand.u32 4294901760, %v2543_v51  ;;  %2095 = vmatprep.subr.bf16.mxu0 %v2846_v10 }
  0x53   : > { %v699_v34 = vand.u32 4294901760, %v2545_v56  ;;  %v641_v31 = vand.u32 4294901760, %v640_v61  ;;  %v653_v50 = vand.u32 4294901760, %v652_v29  ;;  %v664_v24 = vsub.f32 %v2512_v25, %v663_v7  ;;  %535 = vmatmul.mubr.f32.vlgmr.msra.gmra.mrb[0].mxu1 %v534_v54 }
  0x54   : > { %v676_v23 = vsub.f32 %v2524_v32, %v675_v6  ;;  %v1914_v18 = vpack.c.bf16 %v629_v20, %v617_v5  ;;  %v2920_v2 = vpack.c.bf16 %v651_v8, %v639_v43  ;;  %v647_v26 = vand.u32 4294901760, %v646_v22  ;;  %1905 = vmatpush1.bf16.msra.mxu1 %v2863_v49  ;;  %926 = vmatprep.mubr.f32.mxu1 %v2769_v19  ;;  %v3707_v32 = vld [vmem:[#allocation46_spill] sm:$0xff] }
  0x55   : > { %v659_v52 = vand.u32 4294901760, %v658_v42  ;;  %v3650_v62 = vand.u32 4294901760, %v2803_v44  ;;  %v2924_v17 = vpack.c.bf16 %v635_v4, %v623_v55  ;;  %v670_v30 = vsub.f32 %v2534_v45, %v669_v27  ;;  %1907 = vmatprep.subr.bf16.mxu1 %v1906_v39  ;;  %v3651_v55 = vld [vmem:[#allocation39_spill] sm:$0xff] }
  0x56   : > { %v682_v10 = vsub.f32 %v2536_v46, %v681_v48  ;;  %v688_v5 = vsub.f32 %v2543_v51, %v687_v16  ;;  %v700_v20 = vsub.f32 %v2545_v56, %v699_v34  ;;  %v693_v43 = vand.u32 4294901760, %v2560_v0 }
  0x57   : > { %1272 = vmatmul.mubr.f32.vlgmr.msra.gmra.mrb[0].mxu0 %v3650_v62  ;;  %v705_v54 = vand.u32 4294901760, %v2570_v14  ;;  %v1918_v8 = vpack.c.bf16 %v653_v50, %v641_v31  ;;  %v2935_v61 = vpack.c.bf16 %v657_v13, %v645_v40  ;;  %v665_v29 = vand.u32 4294901760, %v664_v24  ;;  %v3653_v40 = vld [vmem:[#allocation42_spill] sm:$0xff] }
  0x58   : > { %2097 = vmatpush1.bf16.msra.mxu0 %v2853_v60  ;;  %v677_v22 = vand.u32 4294901760, %v676_v23  ;;  %v2937_v42 = vpack.c.bf16 %v659_v52, %v647_v26  ;;  %v2939_v49 = vpack.c.bf16 %v675_v6, %v663_v7  ;;  %v711_v60 = vand.u32 4294901760, %v2574_v9  ;;  %1535 = vmatprep.mubr.f32.mxu0 %v2769_v19  ;;  %v3654_v52 = vld [vmem:[#allocation44_spill] sm:$0xff] }
  0x59   : > { %2099 = vmatprep.subr.bf16.mxu0 %v2865_v63  ;;  %v723_v4 = vand.u32 4294901760, %v3651_v55  ;;  %v671_v39 = vand.u32 4294901760, %v670_v30  ;;  %v683_v62 = vand.u32 4294901760, %v682_v10  ;;  %v3652_v63 = vld [vmem:[#allocation41_spill] sm:$0xff]  ;;  %v729_v13 = vand.u32 4294901760, %v3653_v40  ;;  %1909 = vmatpush1.bf16.msra.mxu1 %v2884_v33 }
  0x5a   : > { %v717_v31 = vand.u32 4294901760, %v3652_v63  ;;  %v689_v6 = vand.u32 4294901760, %v688_v5  ;;  %v701_v23 = vand.u32 4294901760, %v700_v20  ;;  %v694_v24 = vsub.f32 %v2560_v0, %v693_v43  ;;  %1911 = vmatprep.subr.bf16.mxu1 %v2896_v11  ;;  %v3655_v10 = vld [vmem:[#allocation45_spill] sm:$0xff] }
  0x5b   : > { %v706_v7 = vsub.f32 %v2570_v14, %v705_v54  ;;  %v1922_v50 = vpack.c.bf16 %v677_v22, %v665_v29  ;;  %v2953_v26 = vpack.c.bf16 %v681_v48, %v669_v27  ;;  %v735_v30 = vand.u32 4294901760, %v3654_v52  ;;  %v3657_v27 = vld [vmem:[#allocation48_spill] sm:$0xff] }
  0x5c   : > { %2101 = vmatpush1.bf16.msra.mxu0 %v2870_v53  ;;  %v747_v44 = vand.u32 4294901760, %v3655_v10  ;;  %v2957_v33 = vpack.c.bf16 %v699_v34, %v687_v16  ;;  %v2959_v53 = vpack.c.bf16 %v705_v54, %v693_v43  ;;  %v712_v5 = vsub.f32 %v2574_v9, %v711_v60 }
  0x5d   : > { %2103 = vmatprep.subr.bf16.mxu0 %v2880_v36  ;;  %v724_v20 = vsub.f32 %v3651_v55, %v723_v4  ;;  %v718_v12 = vsub.f32 %v3652_v63, %v717_v31  ;;  %v730_v11 = vsub.f32 %v3653_v40, %v729_v13  ;;  %v3656_v36 = vld [vmem:[#allocation46_spill] sm:$0xff]  ;;  %v753_v48 = vand.u32 4294901760, %v3657_v27  ;;  %1913 = vmatpush1.bf16.msra.mxu1 %v1912_v28  ;;  %v3659_v55 = vld [vmem:[#allocation51_spill] sm:$0xff] }
  0x5e   : > { %v741_v29 = vand.u32 4294901760, %v3656_v36  ;;  %v1924_v22 = vpack.c.bf16 %v683_v62, %v671_v39  ;;  %v1926_v16 = vpack.c.bf16 %v701_v23, %v689_v6  ;;  %v695_v34 = vand.u32 4294901760, %v694_v24  ;;  %1915 = vmatprep.subr.bf16.mxu1 %v1914_v18  ;;  %v3658_v63 = vld [vmem:[#allocation50_spill] sm:$0xff]  ;;  %v3660_v39 = vld [vmem:[#allocation53_spill] sm:$0xff] }
  0x5f   : > { %v707_v43 = vand.u32 4294901760, %v706_v7  ;;  %v736_v54 = vsub.f32 %v3654_v52, %v735_v30  ;;  %v748_v19 = vsub.f32 %v3655_v10, %v747_v44  ;;  %v759_v40 = vand.u32 4294901760, %v3658_v63  ;;  %v3661_v24 = vld [vmem:[#allocation54_spill] sm:$0xff]  ;;  %v3662_v52 = vld [vmem:[#allocation55_spill] sm:$0xff] }
  0x60   : > { %2105 = vmatpush1.bf16.msra.mxu0 %v2889_v35  ;;  %v771_v9 = vand.u32 4294901760, %v3659_v55  ;;  %v713_v14 = vand.u32 4294901760, %v712_v5  ;;  %v742_v28 = vsub.f32 %v3656_v36, %v741_v29  ;;  %v754_v35 = vsub.f32 %v3657_v27, %v753_v48  ;;  %v3663_v5 = vld [vmem:[#allocation57_spill] sm:$0xff] }
  0x61   : > { %2107 = vmatprep.subr.bf16.mxu0 %v2898_v57  ;;  %v765_v62 = vand.u32 4294901760, %v3660_v39  ;;  %v725_v6 = vand.u32 4294901760, %v724_v20  ;;  %v719_v23 = vand.u32 4294901760, %v718_v12  ;;  %v731_v18 = vand.u32 4294901760, %v730_v11  ;;  %1917 = vmatpush1.bf16.msra.mxu1 %v2924_v17 }
  0x62   : > { %v777_v57 = vand.u32 4294901760, %v3661_v24  ;;  %v1928_v7 = vpack.c.bf16 %v707_v43, %v695_v34  ;;  %v2122_v10 = vpack.c.bf16 %v723_v4, %v711_v60  ;;  %v783_v0 = vand.u32 4294901760, %v3662_v52  ;;  %1919 = vmatprep.subr.bf16.mxu1 %v1918_v8 }
  0x63   : > { %v795_v56 = vand.u32 4294901760, %v3663_v5  ;;  %v737_v27 = vand.u32 4294901760, %v736_v54  ;;  %v749_v36 = vand.u32 4294901760, %v748_v19  ;;  %v760_v12 = vsub.f32 %v3658_v63, %v759_v40  ;;  %v3719_v63 = vld [vmem:[#allocation72_spill] sm:$0xff] }
  0x64   : > { %2109 = vmatpush1.bf16.msra.mxu0 %v2912_v21  ;;  %v772_v20 = vsub.f32 %v3659_v55, %v771_v9  ;;  %v2984_v11 = vpack.c.bf16 %v729_v13, %v717_v31  ;;  %v743_v17 = vand.u32 4294901760, %v742_v28  ;;  %v755_v51 = vand.u32 4294901760, %v754_v35  ;;  %v3720_v55 = vld [vmem:[#allocation73_spill] sm:$0xff] }
  0x65   : > { %2111 = vmatprep.subr.bf16.mxu0 %v2920_v2  ;;  %v766_v21 = vsub.f32 %v3660_v39, %v765_v62  ;;  %v1930_v60 = vpack.c.bf16 %v725_v6, %v713_v14  ;;  %v1932_v4 = vpack.c.bf16 %v731_v18, %v719_v23  ;;  %v2987_v34 = vpack.c.bf16 %v747_v44, %v735_v30  ;;  %v3666_v6 = vld [vmem:[#allocation61_spill] sm:$0xff]  ;;  %v3717_v39 = vld [vmem:[#allocation66_spill] sm:$0xff] }
  0x66   : > { %v778_v8 = vsub.f32 %v3661_v24, %v777_v57  ;;  %1921 = vmatpush1.bf16.msra.mxu1 %v2937_v42  ;;  %v2992_v19 = vpack.c.bf16 %v753_v48, %v741_v29  ;;  %v784_v2 = vsub.f32 %v3662_v52, %v783_v0  ;;  %v796_v31 = vsub.f32 %v3663_v5, %v795_v56  ;;  %v3664_v42 = vld [vmem:[#allocation59_spill] sm:$0xff] }
  0x67   : > { %1923 = vmatprep.subr.bf16.mxu1 %v1922_v50  ;;  %v1934_v13 = vpack.c.bf16 %v749_v36, %v737_v27  ;;  %v761_v14 = vand.u32 4294901760, %v760_v12  ;;  %v773_v43 = vand.u32 4294901760, %v772_v20  ;;  %v2997_v44 = vpack.c.bf16 %v771_v9, %v759_v40  ;;  %v3667_v50 = vld [vmem:[#allocation63_spill] sm:$0xff]  ;;  %v3668_v40 = vld [vmem:[#allocation64_spill] sm:$0xff]  ;;  %v3669_v36 = vld [vmem:[#allocation66_spill] sm:$0xff] }
  0x68   : > { %2113 = vmatpush1.bf16.msra.mxu0 %v2935_v61  ;;  %v2999_v30 = vpack.c.bf16 %v755_v51, %v743_v17  ;;  %v767_v54 = vand.u32 4294901760, %v766_v21  ;;  %v789_v28 = vand.u32 4294901760, %v3664_v42  ;;  %v3665_v61 = vld [vmem:[#allocation60_spill] sm:$0xff]  ;;  %v779_v48 = vand.u32 4294901760, %v778_v8  ;;  %v3671_v17 = vld [vmem:[#allocation69_spill] sm:$0xff] }
  0x69   : > { %2115 = vmatprep.subr.bf16.mxu0 %v2939_v49  ;;  %v801_v29 = vand.u32 4294901760, %v3665_v61  ;;  %v3003_v35 = vpack.c.bf16 %v777_v57, %v765_v62  ;;  %v807_v23 = vand.u32 4294901760, %v3666_v6  ;;  %v819_v18 = vand.u32 4294901760, %v3667_v50  ;;  %v3670_v62 = vld [vmem:[#allocation68_spill] sm:$0xff] }
  0x6a   : > { %1925 = vmatpush1.bf16.msra.mxu1 %v1924_v22  ;;  %v785_v49 = vand.u32 4294901760, %v784_v2  ;;  %v797_v9 = vand.u32 4294901760, %v796_v31  ;;  %v813_v51 = vand.u32 4294901760, %v3668_v40  ;;  %v825_v27 = vand.u32 4294901760, %v3669_v36  ;;  %v3672_v2 = vld [vmem:[#allocation73_spill] sm:$0xff] }
  0x6b   : > { %1927 = vmatprep.subr.bf16.mxu1 %v1926_v16  ;;  %v1938_v12 = vpack.c.bf16 %v773_v43, %v761_v14  ;;  %v3011_v20 = vpack.c.bf16 %v795_v56, %v783_v0  ;;  %v831_v57 = vand.u32 4294901760, %v3670_v62  ;;  %v843_v21 = vand.u32 4294901760, %v3671_v17  ;;  %v3673_v56 = vld [vmem:[#allocation75_spill] sm:$0xff] }
  0x6c   : > { %2117 = vmatpush1.bf16.msra.mxu0 %v2953_v26  ;;  %v790_v22 = vsub.f32 %v3664_v42, %v789_v28  ;;  %v802_v26 = vsub.f32 %v3665_v61, %v801_v29  ;;  %v837_v8 = vand.u32 4294901760, %v2731_v15  ;;  %v849_v31 = vand.u32 4294901760, %v3672_v2  ;;  %v3674_v42 = vld [vmem:[#allocation76_spill] sm:$0xff] }
  0x6d   : > { %2119 = vmatprep.subr.bf16.mxu0 %v2957_v33  ;;  %v3019_v5 = vpack.c.bf16 %v779_v48, %v767_v54  ;;  %v808_v16 = vsub.f32 %v3666_v6, %v807_v23  ;;  %v820_v33 = vsub.f32 %v3667_v50, %v819_v18  ;;  %v855_v0 = vand.u32 4294901760, %v3673_v56 }
  0x6e   : > { %1929 = vmatpush1.bf16.msra.mxu1 %v1928_v7  ;;  %v3025_v14 = vpack.c.bf16 %v797_v9, %v785_v49  ;;  %v814_v43 = vsub.f32 %v3668_v40, %v813_v51  ;;  %v826_v61 = vsub.f32 %v3669_v36, %v825_v27  ;;  %v867_v52 = vand.u32 4294901760, %v3674_v42 }
  0x6f   : > { %1931 = vmatprep.subr.bf16.mxu1 %v1930_v60  ;;  %v3030_v54 = vpack.c.bf16 %v801_v29, %v789_v28  ;;  %v832_v48 = vsub.f32 %v3670_v62, %v831_v57  ;;  %v844_v50 = vsub.f32 %v3671_v17, %v843_v21  ;;  %v791_v6 = vand.u32 4294901760, %v790_v22  ;;  %v3677_v17 = vld [vmem:[#allocation82_spill] sm:$0xff] }
  0x70   : > { %2121 = vmatpush1.bf16.msra.mxu0 %v2959_v53  ;;  %v803_v7 = vand.u32 4294901760, %v802_v26  ;;  %v838_v53 = vsub.f32 %v2731_v15, %v837_v8  ;;  %v850_v49 = vsub.f32 %v3672_v2, %v849_v31  ;;  %v809_v9 = vand.u32 4294901760, %v808_v16  ;;  %v3675_v16 = vld [vmem:[#allocation77_spill] sm:$0xff] }
  0x71   : > { %2123 = vmatprep.subr.bf16.mxu0 %v2122_v10  ;;  %v821_v40 = vand.u32 4294901760, %v820_v33  ;;  %v856_v36 = vsub.f32 %v3673_v56, %v855_v0  ;;  %v868_v24 = vsub.f32 %v3674_v42, %v867_v52  ;;  %v3039_v10 = vpack.c.bf16 %v819_v18, %v807_v23  ;;  %v3676_v56 = vld [vmem:[#allocation81_spill] sm:$0xff] }
  0x72   : > { %1933 = vmatpush1.bf16.msra.mxu1 %v1932_v4  ;;  %v815_v60 = vand.u32 4294901760, %v814_v43  ;;  %v827_v28 = vand.u32 4294901760, %v826_v61  ;;  %v3041_v29 = vpack.c.bf16 %v825_v27, %v813_v51  ;;  %v833_v22 = vand.u32 4294901760, %v832_v48  ;;  %v3697_v48 = vld [vmem:[#allocation32_spill] sm:$0xff] }
  0x73   : > { %1935 = vmatprep.subr.bf16.mxu1 %v1934_v13  ;;  %v845_v26 = vand.u32 4294901760, %v844_v50  ;;  %v861_v33 = vand.u32 4294901760, %v3675_v16  ;;  %v873_v2 = vand.u32 4294901760, %v3676_v56  ;;  %v1944_v42 = vpack.c.bf16 %v803_v7, %v791_v6  ;;  %v3678_v6 = vld [vmem:[#allocation85_spill] sm:$0xff]  ;;  %v3683_v7 = vld [vmem:[#allocation8_spill] sm:$0xff] }
  0x74   : > { %2125 = vmatpush1.bf16.msra.mxu0 %v2984_v11  ;;  %v839_v4 = vand.u32 4294901760, %v838_v53  ;;  %v851_v15 = vand.u32 4294901760, %v850_v49  ;;  %v3541_v11 = vand.u32 4294901760, %v3677_v17  ;;  %v1946_v23 = vpack.c.bf16 %v821_v40, %v809_v9  ;;  %v3095_v9 = vld [vmem:[%s243_s23] sm:$0xf]  ;;  %v3695_v49 = vld [vmem:[#allocation93_spill] sm:$0xff] }
  0x75   : > { %2127 = vmatprep.subr.bf16.mxu0 %v2987_v34  ;;  %v3048_v18 = vpack.c.bf16 %v843_v21, %v831_v57  ;;  %v857_v61 = vand.u32 4294901760, %v856_v36  ;;  %v869_v51 = vand.u32 4294901760, %v868_v24  ;;  %v1948_v34 = vpack.c.bf16 %v827_v28, %v815_v60  ;;  %v3696_v53 = vld [vmem:[#allocation95_spill] sm:$0xff] }
  0x76   : > { %1937 = vmatpush1.bf16.msra.mxu1 %v2999_v30  ;;  %v3052_v13 = vpack.c.bf16 %v849_v31, %v837_v8  ;;  %v3054_v50 = vpack.c.bf16 %v867_v52, %v855_v0  ;;  %v3539_v27 = vand.u32 4294901760, %v3678_v6  ;;  %v1950_v43 = vpack.c.bf16 %v845_v26, %v833_v22  ;;  %v3679_v30 = vld [vmem:[#allocation87_spill] sm:$0xff] }
  0x77   : > { %1939 = vmatprep.subr.bf16.mxu1 %v1938_v12  ;;  %v3059_v40 = vsub.f32 %v3675_v16, %v861_v33  ;;  %v3062_v24 = vsub.f32 %v3676_v56, %v873_v2  ;;  %v3538_v36 = vand.u32 4294901760, %v3679_v30  ;;  %v3068_v52 = vpack.c.bf16 %v851_v15, %v839_v4  ;;  %v3680_v12 = vld [vmem:[#allocation89_spill] sm:$0xff]  ;;  %v3681_v8 = vld [vmem:[#allocation91_spill] sm:$0xff]  ;;  %v3687_v4 = vld [vmem:[#allocation14_spill] sm:$0xff] }
  0x78   : > { %2129 = vmatpush1.bf16.msra.mxu0 %v2992_v19  ;;  %v3070_v19 = vpack.c.bf16 %v873_v2, %v861_v33  ;;  %v3537_v57 = vand.u32 4294901760, %v3680_v12  ;;  %v3078_v21 = vpack.c.bf16 %v869_v51, %v857_v61  ;;  %v3536_v31 = vand.u32 4294901760, %v3681_v8  ;;  %v3682_v2 = vld [vmem:[#allocation7_spill] sm:$0xff]  ;;  %v3698_v61 = vld [vmem:[#allocation33_spill] sm:$0xff]  ;;  %v3729_v16 = vld [vmem:[#allocation78_spill] sm:$0xff] }
  0x79   : > { %2131 = vmatprep.subr.bf16.mxu0 %v2997_v44  ;;  %v3075_v44 = vsub.f32 %v3677_v17, %v3541_v11  ;;  %v3540_v0 = vand.u32 4294901760, %v2821_v3  ;;  %v3089_v15 = vsub.f32 %v3678_v6, %v3539_v27  ;;  %v3104_v60 = vsub.f32 %v3679_v30, %v3538_v36  ;;  %v3684_v26 = vld [vmem:[#allocation11_spill] sm:$0xff]  ;;  %v3701_v11 = vld [vmem:[#allocation38_spill] sm:$0xff]  ;;  %v3716_v36 = vld [vmem:[#allocation64_spill] sm:$0xff] }
  0x7a   : > { %1941 = vmatpush1.bf16.msra.mxu1 %v3019_v5  ;;  %v863_v5 = vand.u32 4294901760, %v3059_v40  ;;  %v3110_v22 = vsub.f32 %v3680_v12, %v3537_v57  ;;  %v3534_v51 = vmov 2   ;;  %v3120_v40 = vsub.f32 %v3681_v8, %v3536_v31  ;;  %v3700_v31 = vld [vmem:[#allocation36_spill] sm:$0xff]  ;;  %v3721_v28 = vld [vmem:[#allocation75_spill] sm:$0xff] }
  0x7b   : > { %1943 = vmatprep.subr.bf16.mxu1 %v3025_v14  ;;  %v3685_v14 = vld [vmem:[#allocation12_spill] sm:$0xff]  ;;  %2264 = vset.pattern.permute.xlu1 %v3534_v51  ;;  %v3546_v33 = vmov 1   ;;  %v893_v51 = vand.u32 4294901760, %v3089_v15  ;;  %v3723_v15 = vld [vmem:[#allocation71_spill] sm:$0xff]  ;;  %v2298_v25 = vmov 0   ;;  %v3724_v45 = vand.u32 4294901760, %v3695_v49 }
  0x7c   : > { %2133 = vmatpush1.bf16.msra.mxu0 %v3003_v35  ;;  %v875_v35 = vand.u32 4294901760, %v3062_v24  ;;  %v3125_v24 = vsub.f32 %v2821_v3, %v3540_v0  ;;  %325 = vperm.xlu1 %2264, %v3095_v9   ;;  %v3713_v0 = vld [vmem:[#allocation60_spill] sm:$0xff] }
  0x7d   : > { %2135 = vmatprep.subr.bf16.mxu0 %v3011_v20  ;;  %v3686_v20 = vld [vmem:[#allocation13_spill] sm:$0xff]  ;;  %2262 = vset.pattern.permute.xlu0 %v3546_v33  ;;  %v3722_v27 = vld [vmem:[#allocation76_spill] sm:$0xff]  ;;  %v905_v33 = vand.u32 4294901760, %v3120_v40 }
  0x7e   : > { %1945 = vmatpush1.bf16.msra.mxu1 %v1944_v42  ;;  %317 = vperm.xlu0 %2262, %v3095_v9   ;;  %v3715_v42 = vld [vmem:[#allocation63_spill] sm:$0xff]  ;;  %v1956_v57 = vpack.c.bf16 %v875_v35, %v863_v5  ;;  %v910_v5 = vsub.f32 %v3695_v49, %v3724_v45  ;;  %v3725_v35 = vand.u32 4294901760, %v3696_v53  ;;  %v917_v45 = vand.u32 4294901760, %v3125_v24 }
  0x7f   : > { %1947 = vmatprep.subr.bf16.mxu1 %v1946_v23  ;;  %v3702_v23 = vld [vmem:[#allocation39_spill] sm:$0xff]  ;;  %v3732_v24 = vand.u32 4294901760, %v3681_v8 }
  0x80   : > { %2137 = vmatpush1.bf16.msra.mxu0 %v3030_v54  ;;  %v3708_v54 = vld [vmem:[#allocation48_spill] sm:$0xff]  ;;  %260 = vrot.lane.b32.xlu1 %v3723_v15, %s2297_s25  ;;  %v911_v40 = vand.u32 4294901760, %v910_v5  ;;  %v3738_v5 = vmov 2  }
  0x81   : > { %2139 = vmatprep.subr.bf16.mxu0 %v3039_v10  ;;  %v3712_v10 = vld [vmem:[#allocation59_spill] sm:$0xff]  ;;  %2265 = vset.pattern.permute.xlu1 %v2298_v25 }
  0x82   : > { %1949 = vmatpush1.bf16.msra.mxu1 %v1948_v34  ;;  %v3718_v34 = vld [vmem:[#allocation69_spill] sm:$0xff]  ;;  %2263 = vset.pattern.permute.xlu0 %v2298_v25  ;;  %v3726_v25 = vand.u32 4294901760, %v3075_v44 }
  0x83   : > { %1951 = vmatprep.subr.bf16.mxu1 %v1950_v43  ;;  %v899_v43 = vand.u32 4294901760, %v3110_v22  ;;  %311 = vperm.xlu0 %2263, %v3095_v9   ;;  %v1962_v9 = vpack.c.bf16 %v917_v45, %v905_v33  ;;  %v3736_v33 = vpack.c.bf16 %v2418_v38, %v2416_v37  ;;  %v3741_v45 = vpack.c.bf16 %v3683_v7, %v3682_v2  ;;  %v3744_v38 = vld [vmem:[#allocation4_spill] sm:$0xff]  ;;  %v3748_v2 = vld [vmem:[#allocation5_spill] sm:$0xff] }
  0x84   : > { %2141 = vmatpush1.bf16.msra.mxu0 %v3041_v29  ;;  %v922_v29 = vsub.f32 %v3696_v53, %v3725_v35  ;;  %262 = vrot.lane.b32.xlu1 %v3729_v16, %s2297_s25  ;;  %v3743_v37 = vpack.c.bf16 %v2436_v47, %v2424_v41  ;;  %v3749_v7 = vpack.c.bf16 %v3687_v4, %v3686_v20  ;;  %v3750_v41 = vld [vmem:[#allocation6_spill] sm:$0xff]  ;;  %v3760_v4 = vld [vmem:[#allocation17_spill] sm:$0xff] }
  0x85   : > { %2143 = vmatprep.subr.bf16.mxu0 %v3048_v18  ;;  %v887_v18 = vand.u32 4294901760, %v3104_v60  ;;  %v3728_v60 = vand.u32 4294901760, %v3678_v6  ;;  %v3751_v47 = vpack.c.bf16 %v2461_v59, %v2459_v58  ;;  %v3764_v58 = vld [vmem:[#allocation20_spill] sm:$0xff]  ;;  %v3765_v59 = vld [vmem:[#allocation25_spill] sm:$0xff] }
  0x86   : > { %1953 = vmatpush1.bf16.msra.mxu1 %v3068_v52  ;;  %v1958_v52 = vpack.c.bf16 %v893_v51, %v3726_v25  ;;  %v3731_v51 = vand.u32 4294901760, %v3680_v12  ;;  %v923_v25 = vand.u32 4294901760, %v922_v29  ;;  %v3735_v29 = vand.u32 4294901760, %v3696_v53 }
  0x87   : > { %1955 = vmatprep.subr.bf16.mxu1 %v3078_v21  ;;  %v1960_v44 = vpack.c.bf16 %v899_v43, %v887_v18  ;;  %v3730_v21 = vand.u32 4294901760, %v3679_v30  ;;  %269 = vrot.lane.b32.xlu0 %v3723_v15, %s2299_s28  ;;  %v3734_v18 = vand.u32 4294901760, %v3695_v49  ;;  %v3737_v15 = vld [vmem:[#allocation2_spill] sm:$0xff] }
  0x88   : > { %2145 = vmatpush1.bf16.msra.mxu0 %v3052_v13  ;;  %v3727_v13 = vand.u32 4294901760, %v3677_v17  ;;  %271 = vrot.lane.b32.xlu1 %v3729_v16, %s2299_s28 }
  0x89   : > { %2147 = vmatprep.subr.bf16.mxu0 %v3054_v50  ;;  %v256_v50 = vld [vmem:[%s3399_s2] sm:$0xf]  ;;  %v2152_v35 = vpack.c.bf16 %v3731_v51, %v3730_v21  ;;  %v2156_v43 = vpack.c.bf16 %v3735_v29, %v3734_v18  ;;  %v3745_v21 = vld [vmem:[#allocation88_spill] sm:$0xff]  ;;  %v3746_v51 = vld [vmem:[#allocation83_spill] sm:$0xff] }
  0x8a   : > { %v2150_v22 = vpack.c.bf16 %v3728_v60, %v3727_v13  ;;  %1957 = vmatpush1.bf16.msra.mxu1 %v1956_v57  ;;  %v3733_v13 = vand.u32 4294901760, %v2821_v3  ;;  %v1964_v57 = vpack.c.bf16 %v923_v25, %v911_v40  ;;  %v3752_v40 = vld [vmem:[#allocation9_spill] sm:$0xff]  ;;  %v3754_v25 = vld [vmem:[#allocation15_spill] sm:$0xff] }
  0x8b   : > { %1959 = vmatprep.subr.bf16.mxu1 %v1958_v52  ;;  %v3739_v52 = vmov 1   ;;  %v3768_v29 = vld [vmem:[#allocation23_spill] sm:$0xff] }
  0x8c   : > { %2149 = vmatpush1.bf16.msra.mxu0 %v3070_v19  ;;  %v2154_v60 = vpack.c.bf16 %v3733_v13, %v3732_v24  ;;  %v1680_v19 = vadd.f32 1.0, %v256_v50  ;;  %1690 = vperm.xlu1 %2265, %v256_v50   ;;  %v3758_v24 = vld [vmem:[#allocation18_spill] sm:$0xff] }
  0x8d   : > { %2151 = vmatprep.subr.bf16.mxu0 %v2150_v22  ;;  %v3740_v22 = vld [vmem:[#allocation80_spill] sm:$0xff]  ;;  %v3761_v13 = vld [vmem:[#allocation22_spill] sm:$0xff] }
  0x8e   : > { %1961 = vmatpush1.bf16.msra.mxu1 %v1960_v44  ;;  %1683 = vperm.xlu0 %2263, %v1680_v19   ;;  %v3742_v44 = vld [vmem:[#allocation3_spill] sm:$0xff] }
  0x8f   : > { %1963 = vmatprep.subr.bf16.mxu1 %v1962_v9  ;;  %v3757_v9 = vld [vmem:[#allocation19_spill] sm:$0xff] }
  0x90   : > { %2153 = vmatpush1.bf16.msra.mxu0 %v2152_v35  ;;  %2266 = vset.pattern.permute.xlu1 %v3738_v5  ;;  %v3747_v35 = vpack.c.bf16 %v3685_v14, %v3684_v26  ;;  %v3756_v14 = vld [vmem:[#allocation10_spill] sm:$0xff]  ;;  %v3759_v20 = vpack.c.bf16 %v3757_v9, %v3758_v24  ;;  %v3796_v9 = vld [vmem:[#allocation49_spill] sm:$0xff] }
  0x91   : > { %2155 = vmatprep.subr.bf16.mxu0 %v2154_v60  ;;  %1704 = vperm.xlu1 %2266, %v1680_v19   ;;  %v3762_v60 = vld [vmem:[#allocation21_spill] sm:$0xff]  ;;  %v3797_v24 = vld [vmem:[#allocation54_spill] sm:$0xff] }
  0x92   : > { %1965 = vmatpush1.bf16.msra.mxu1 %v1964_v57  ;;  %2267 = vset.pattern.permute.xlu0 %v3739_v52  ;;  %v3763_v19 = vpack.c.bf16 %v3761_v13, %v3762_v60  ;;  %v3766_v57 = vld [vmem:[#allocation24_spill] sm:$0xff]  ;;  %v3773_v52 = vld [vmem:[#allocation30_spill] sm:$0xff]  ;;  %v3801_v60 = vld [vmem:[#allocation57_spill] sm:$0xff] }
  0x93   : > { %1967 = vmatprep.subr.bf16.mxu1 %v3736_v33  ;;  %1698 = vperm.xlu0 %2267, %v256_v50   ;;  %v3753_v50 = vld [vmem:[#allocation16_spill] sm:$0xff]  ;;  %v3767_v18 = vpack.c.bf16 %v3765_v59, %v3766_v57  ;;  %v3770_v33 = vld [vmem:[#allocation26_spill] sm:$0xff]  ;;  %v3807_v57 = vpack.c.bf16 %v3715_v42, %v3714_v1  ;;  %v3815_v42 = vpack.c.bf16 %v3722_v27, %v3721_v28 }
  0x94   : > { %2157 = vmatpush1.bf16.msra.mxu0 %v2156_v43  ;;  %v3755_v26 = vpack.c.bf16 %v3753_v50, %v3754_v25  ;;  %v3769_v43 = vld [vmem:[#allocation28_spill] sm:$0xff]  ;;  %v3791_v25 = vpack.c.bf16 %v3708_v54, %v3707_v32  ;;  %v3805_v54 = vpack.c.bf16 %v3713_v0, %v3712_v10  ;;  %v3806_v59 = vld [vmem:[#allocation58_spill] sm:$0xff]  ;;  %v3812_v0 = vld [vmem:[#allocation67_spill] sm:$0xff]  ;;  %v3813_v10 = vpack.c.bf16 %v3720_v55, %v3719_v63 }
  0x95   : > { %2159 = vmatprep.subr.bf16.mxu0 %v3737_v15  ;;  %928 = vmatmul.mubr.f32.vlgmr.msra.gmra.mrb[0].mxu1 %v3740_v22  ;;  %v3771_v15 = vpack.c.bf16 %v3769_v43, %v3770_v33  ;;  %v3800_v13 = vld [vmem:[#allocation52_spill] sm:$0xff]  ;;  %v3810_v43 = vld [vmem:[#allocation65_spill] sm:$0xff]  ;;  %v3811_v33 = vpack.c.bf16 %v3718_v34, %v3670_v62  ;;  %v3814_v1 = vld [vmem:[#allocation70_spill] sm:$0xff]  ;;  %v3820_v34 = vpack.c.bf16 %v3678_v6, %v3677_v17 }
  0x96   : > { %1969 = vmatpush1.bf16.msra.mxu1 %v3741_v45  ;;  %1128 = vmatprep.mubr.f32.mxu1 %v3745_v21  ;;  %v3774_v45 = vpack.c.bf16 %v2536_v46, %v3773_v52  ;;  %v3778_v21 = vld [vmem:[#allocation35_spill] sm:$0xff]  ;;  %v3782_v46 = vld [vmem:[#allocation37_spill] sm:$0xff]  ;;  %v3804_v32 = vld [vmem:[#allocation56_spill] sm:$0xff]  ;;  %v3822_v63 = vpack.c.bf16 %v3680_v12, %v3679_v30  ;;  %v3824_v28 = vpack.c.bf16 %v2821_v3, %v3681_v8 }
  0x97   : > { %1537 = vmatmul.mubr.f32.vlgmr.msra.gmra.mrb[0].mxu0 %v3740_v22  ;;  %1971 = vmatprep.subr.bf16.mxu1 %v3743_v37  ;;  %v3776_v37 = vpack.c.bf16 %v3698_v61, %v3697_v48  ;;  %v3786_v48 = vld [vmem:[#allocation40_spill] sm:$0xff]  ;;  %v3787_v61 = vld [vmem:[#allocation45_spill] sm:$0xff]  ;;  %v3819_v62 = vld [vmem:[#allocation79_spill] sm:$0xff] }
  0x98   : > { %2161 = vmatpush1.bf16.msra.mxu0 %v3742_v44  ;;  %1672 = vmatprep.mubr.f32.mxu0 %v3746_v51  ;;  %v3775_v44 = vld [vmem:[#allocation29_spill] sm:$0xff]  ;;  %v3779_v51 = vpack.c.bf16 %v3700_v31, %v3778_v21  ;;  %v3790_v31 = vld [vmem:[#allocation43_spill] sm:$0xff]  ;;  %v3821_v55 = vld [vmem:[#allocation84_spill] sm:$0xff] }
  0x99   : > { %2163 = vmatprep.subr.bf16.mxu0 %v3744_v38  ;;  %2268 = vset.pattern.permute.xlu0 %v3738_v5  ;;  %v3772_v5 = vld [vmem:[#allocation27_spill] sm:$0xff]  ;;  %v3823_v27 = vld [vmem:[#allocation86_spill] sm:$0xff] }
  0x9a   : > { %1973 = vmatpush1.bf16.msra.mxu1 %v3747_v35  ;;  %v3777_v38 = vld [vmem:[#allocation31_spill] sm:$0xff]  ;;  %v3780_v35 = vld [vmem:[#allocation34_spill] sm:$0xff] }
  0x9b   : > { %1975 = vmatprep.subr.bf16.mxu1 %v3749_v7  ;;  %v3783_v7 = vld [vmem:[#allocation42_spill] sm:$0xff] }
  0x9c   : > { %2165 = vmatpush1.bf16.msra.mxu0 %v3748_v2  ;;  %v3781_v2 = vpack.c.bf16 %v3702_v23, %v3701_v11  ;;  %v3792_v11 = vld [vmem:[#allocation47_spill] sm:$0xff]  ;;  %v3827_v17 = vld [vmem:[#allocation94_spill] sm:$0xff] }
  0x9d   : > { %2167 = vmatprep.subr.bf16.mxu0 %v3750_v41  ;;  %v3784_v41 = vld [vmem:[#allocation41_spill] sm:$0xff]  ;;  %v3793_v23 = vld [vmem:[#allocation51_spill] sm:$0xff]  ;;  %v3828_v6 = vld [vmem:[#allocation90_spill] sm:$0xff] }
  0x9e   : > { %1977 = vmatpush1.bf16.msra.mxu1 %v3751_v47  ;;  %v3785_v47 = vpack.c.bf16 %v3783_v7, %v3784_v41  ;;  %v2300_v41 = vmov 839922192  }
  0x9f   : > { %1979 = vmatprep.subr.bf16.mxu1 %v3755_v26  ;;  %v3794_v26 = vld [vmem:[#allocation50_spill] sm:$0xff] }
  0xa0   : > { %2169 = vmatpush1.bf16.msra.mxu0 %v3752_v40  ;;  %v3788_v40 = vld [vmem:[#allocation44_spill] sm:$0xff] }
  0xa1   : > { %2171 = vmatprep.subr.bf16.mxu0 %v3756_v14  ;;  %v3789_v50 = vpack.c.bf16 %v3787_v61, %v3788_v40  ;;  %v3795_v14 = vpack.c.bf16 %v3793_v23, %v3794_v26 }
  0xa2   : > { %1981 = vmatpush1.bf16.msra.mxu1 %v3759_v20  ;;  %v3798_v20 = vld [vmem:[#allocation53_spill] sm:$0xff] }
  0xa3   : > { %1983 = vmatprep.subr.bf16.mxu1 %v3763_v19  ;;  %v3802_v19 = vld [vmem:[#allocation55_spill] sm:$0xff] }
  0xa4   : > { %2173 = vmatpush1.bf16.msra.mxu0 %v3760_v4  ;;  %v3799_v4 = vpack.c.bf16 %v3797_v24, %v3798_v20 }
  0xa5   : > { %2175 = vmatprep.subr.bf16.mxu0 %v3764_v58  ;;  %v3803_v58 = vpack.c.bf16 %v3801_v60, %v3802_v19 }
  0xa6   : > { %1985 = vmatpush1.bf16.msra.mxu1 %v3767_v18  ;;  %v3808_v18 = vld [vmem:[#allocation62_spill] sm:$0xff] }
  0xa7   : > { %1987 = vmatprep.subr.bf16.mxu1 %v3771_v15 }
  0xa8   : > { %2177 = vmatpush1.bf16.msra.mxu0 %v3768_v29  ;;  %v3809_v29 = vpack.c.bf16 %v3717_v39, %v3716_v36  ;;  %v3816_v39 = vld [vmem:[#allocation74_spill] sm:$0xff]  ;;  %v3817_v36 = vld [vmem:[#allocation77_spill] sm:$0xff] }
  0xa9   : > { %2179 = vmatprep.subr.bf16.mxu0 %v3772_v5  ;;  %v3818_v15 = vpack.c.bf16 %v3676_v56, %v3817_v36  ;;  %v3825_v56 = vld [vmem:[#allocation92_spill] sm:$0xff]  ;;  %v3826_v5 = vpack.c.bf16 %v3696_v53, %v3695_v49 }
  0xaa   : > { %1989 = vmatpush1.bf16.msra.mxu1 %v3774_v45  ;;  %v264_v45 = vlaneseq }
  0xab   : > { %1991 = vmatprep.subr.bf16.mxu1 %v3776_v37 }
  0xac   : > { %2181 = vmatpush1.bf16.msra.mxu0 %v3775_v44  ;;  %v265_v44 = vand.u32 127, %v264_v45 }
  0xad   : > { %2183 = vmatprep.subr.bf16.mxu0 %v3777_v38 }
  0xae   : > { %1993 = vmatpush1.bf16.msra.mxu1 %v3779_v51  ;;  %v276_v8 = vadd.s32 128, %v265_v44  ;;  %v281_v38 = vand.u32 15, %v265_v44  ;;  %vm266_vm0 = vcmp.lt.s32.totalorder %v265_v44, 1  ;;  %vm273_vm1 = vcmp.lt.s32.totalorder %v265_v44, 127 }
  0xaf   : > { %1995 = vmatprep.subr.bf16.mxu1 %v3781_v2 }
  0xb0   : > { %2185 = vmatpush1.bf16.msra.mxu0 %v3780_v35  ;;  %v288_v53 = vand.u32 15, %v276_v8  ;;  %vm3369_vm2 = vcmp.eq.s32.totalorder %v281_v38, 0  ;;  %vm305_vm4 = vcmp.eq.s32.totalorder %v281_v38, 15 }
  0xb1   : > { %2187 = vmatprep.subr.bf16.mxu0 %v3782_v46 }
  0xb2   : > { %1997 = vmatpush1.bf16.msra.mxu1 %v3785_v47  ;;  %vm3373_vm3 = vcmp.eq.s32.totalorder %v288_v53, 0  ;;  %v1707_v47 = vunpack.c.l.s4 %v2300_v41  ;;  %vm306_vm5 = vcmp.eq.s32.totalorder %v288_v53, 15 }
  0xb3   : > { %1999 = vmatprep.subr.bf16.mxu1 %v3789_v50 }
  0xb4   : > { %2189 = vmatpush1.bf16.msra.mxu0 %v3786_v48  ;;  %v1708_v50 = vunpack.c.0.s8 %v1707_v47 }
  0xb5   : > { %2191 = vmatprep.subr.bf16.mxu0 %v3790_v31  ;;  %v1710_v31 = vshrl.u32 %v264_v45, 7 }
  0xb6   : > { %2001 = vmatpush1.bf16.msra.mxu1 %v3791_v25  ;;  %v2270_v25 = vld [vmem:[%s2692_s24] sm:$0xff] }
  0xb7   : > { %2003 = vmatprep.subr.bf16.mxu1 %v3795_v14  ;;  %v1711_v20 = vsub.s32 %v1708_v50, %v1710_v31 }
  0xb8   : > { %2193 = vmatpush1.bf16.msra.mxu0 %v3792_v11 }
  0xb9   : > { %2195 = vmatprep.subr.bf16.mxu0 %v3796_v9 }
  0xba   : > { %2005 = vmatpush1.bf16.msra.mxu1 %v3799_v4 }
  0xbb   : > { %2007 = vmatprep.subr.bf16.mxu1 %v3803_v58 }
  0xbc   : > { %2197 = vmatpush1.bf16.msra.mxu0 %v3800_v13 }
  0xbd   : > { %2199 = vmatprep.subr.bf16.mxu0 %v3804_v32 }
  0xbe   : > { %2009 = vmatpush1.bf16.msra.mxu1 %v3805_v54 }
  0xbf   : > { %2011 = vmatprep.subr.bf16.mxu1 %v3807_v57 }
  0xc0   : > { %2201 = vmatpush1.bf16.msra.mxu0 %v3806_v59 }
  0xc1   : > { %2203 = vmatprep.subr.bf16.mxu0 %v3808_v18 }
  0xc2   : > { %2013 = vmatpush1.bf16.msra.mxu1 %v3809_v29 }
  0xc3   : > { %2015 = vmatprep.subr.bf16.mxu1 %v3811_v33 }
  0xc4   : > { %2205 = vmatpush1.bf16.msra.mxu0 %v3810_v43 }
  0xc5   : > { %2207 = vmatprep.subr.bf16.mxu0 %v3812_v0 }
  0xc6   : > { %2017 = vmatpush1.bf16.msra.mxu1 %v3813_v10 }
  0xc7   : > { %2019 = vmatprep.subr.bf16.mxu1 %v3815_v42 }
  0xc8   : > { %2209 = vmatpush1.bf16.msra.mxu0 %v3814_v1 }
  0xc9   : > { %2211 = vmatprep.subr.bf16.mxu0 %v3816_v39 }
  0xca   : > { %2021 = vmatpush1.bf16.msra.mxu1 %v3818_v15 }
  0xcb   : > { %2023 = vmatprep.subr.bf16.mxu1 %v3820_v34 }
  0xcc   : > { %2213 = vmatpush1.bf16.msra.mxu0 %v3819_v62 }
  0xcd   : > { %2215 = vmatprep.subr.bf16.mxu0 %v3821_v55 }
  0xce   : > { %2025 = vmatpush1.bf16.msra.mxu1 %v3822_v63 }
  0xcf   : > { %2027 = vmatprep.subr.bf16.mxu1 %v3824_v28 }
  0xd0   : > { %2217 = vmatpush1.bf16.msra.mxu0 %v3823_v27 }
  0xd1   : > { %2219 = vmatprep.subr.bf16.mxu0 %v3825_v56 }
  0xd2   : > { %2029 = vmatpush1.bf16.msra.mxu1 %v3826_v5 }
  0xd4   : > { %2221 = vmatpush1.bf16.msra.mxu0 %v3827_v17 }
  0xd5   : > { %1131 = vmatmul.mubr.f32.vlgmr.msra.gmra.mrb[0].mxu1 %v3828_v6 }
  0xd7   : > { %1674 = vmatmul.mubr.f32.vlgmr.msra.gmra.mrb[0].mxu0 %v3740_v22 }
  0xfb   : > { %v326_v30 = vpop.permute.xlu1 %325 }
  0xfd   : > { %v318_v12 = vpop.permute.xlu0 %317 }
  0xfe   : > { %v320_v11 = vmul.f32 %v2270_v25, %v318_v12  ;;  %v321_v26 = vmul.f32 %v318_v12, %v3729_v16 }
  0xff   : > { %v261_v52 = vpop.permute.xlu1 %260 }
 0x102   : > { %v312_v37 = vpop.permute.xlu0 %311 }
 0x103   : > { %v263_v3 = vpop.permute.xlu1 %262 }
 0x104   : > { %v268_v51 = vsel %vm266_vm0, %v263_v3, %v261_v52  ;;  %v267_v2 = vsel %vm266_vm0, %v261_v52, %v263_v3 }
 0x106   : > { %v270_v21 = vpop.permute.xlu0 %269 }
 0x107   : > { %v272_v49 = vpop.permute.xlu1 %271 }
 0x108   : > { %v274_v22 = vsel %vm273_vm1, %v270_v21, %v272_v49  ;;  %v275_v7 = vsel %vm273_vm1, %v272_v49, %v270_v21 }
 0x109   : > { %v303_v48 = vsel %vm3369_vm2, %v274_v22, %v268_v51  ;;  %v304_v61 = vsel %vm3373_vm3, %v275_v7, %v267_v2  ;;  %v307_v14 = vsel %vm305_vm4, %v268_v51, %v274_v22  ;;  %v308_v24 = vsel %vm306_vm5, %v267_v2, %v275_v7 }
 0x10a   : > { %v314_v23 = vmul.f32 %v312_v37, %v303_v48  ;;  %v315_v9 = vmul.f32 %v312_v37, %v304_v61  ;;  %v328_v4 = vmul.f32 %v326_v30, %v307_v14  ;;  %v329_v19 = vmul.f32 %v326_v30, %v308_v24 }
 0x10b   : > { %v1691_v40 = vpop.permute.xlu1 %1690 }
 0x10c   : > { %v322_v13 = vadd.f32 %v320_v11, %v314_v23  ;;  %v323_v58 = vadd.f32 %v321_v26, %v315_v9 }
 0x10d   : > { %v1684_v54 = vpop.permute.xlu0 %1683 }
 0x10e   : > { %v330_v59 = vadd.f32 %v328_v4, %v322_v13  ;;  %v331_v57 = vadd.f32 %v329_v19, %v323_v58 }
 0x110   : > { %v1705_v60 = vpop.permute.xlu1 %1704  ;;  %v1686_v1 = vmul.f32 %v1684_v54, %v330_v59  ;;  %v1687_v39 = vmul.f32 %v1684_v54, %v331_v57 }
 0x111   : > { %v1712_v32 = vrot.slane %v1705_v60, %v1711_v20 }
 0x112   : > { %v1699_v15 = vpop.permute.xlu0 %1698 }
 0x113   : > { %v1714_v10 = vmul.f32 %v2270_v25, %v1712_v32 }
 0x115   : > { %v1716_v55 = vcombine.high %v1714_v10, %v1714_v10 }
 0x1a8   : > { %v1132_v18 = vpop.f32.mrb[0].mxu1 }
 0x1a9   : > { %v1134_v33 = vpop.f32.mrb[1].mxu1 }
 0x1aa   : > { %v1675_v29 = vpop.f32.mrb[0].mxu0 }
 0x1ab   : > { %v2222_v43 = vadd.f32 %v1675_v29, %v1132_v18  ;;  %v1677_v0 = vpop.f32.mrb[1].mxu0 }
 0x1ac   : > { %v2223_v16 = vadd.f32 %v1677_v0, %v1134_v33 }
 0x1ad   : > { %v1693_v42 = vmul.f32 %v2222_v43, %v1691_v40 }
 0x1ae   : > { %v1694_v36 = vmul.f32 %v2223_v16, %v1691_v40 }
 0x1af   : > { %v1695_v62 = vsub.f32 %v1686_v1, %v1693_v42 }
 0x1b0   : > { %v1696_v34 = vsub.f32 %v1687_v39, %v1694_v36 }
 0x1b1   : > { %v1701_v63 = vmul.f32 %v1699_v15, %v1695_v62 }
 0x1b2   : > { %v1702_v27 = vmul.f32 %v1699_v15, %v1696_v34 }
 0x1b3   : > { %v1718_v28 = vadd.f32 %v1714_v10, %v1701_v63 }
 0x1b4   : > { %v1719_v56 = vadd.f32 %v1716_v55, %v1702_v27 }
 0x1b6   : > { %v1722_v5 = vcombine.low %v1718_v28, %v1719_v56 }
 0x1b8   : > { %1724 = vst [vmem:[%s252_s30] sm:$0xff] %v1722_v5 }
 0x1b9 PF: > { %s14_s17 = sadd.s32 1, %s2293_s17   ;;  %s3833_s15 = smov %s2289_s16 }
 0x1ba   : > { %p11_p5 = scmp.ge.s32.totalorder %s14_s17, 4   ;;  %s3834_s16 = smov %s3836_s18 }
 0x1bc   :  { %13 = sbr.rel (!%p11_p5) target bundleno = 2 (0x2), region = 69 }

</bundles_post_ra>
